<compile_context>
chip_gen: v7x
topology: tpu7x:2x2x1
jax: 0.10.0
libtpu: 0.0.40
codegen_flags: <defaults>
</compile_context>

<pallas_src>
import functools

import jax
import jax.numpy as jnp
from jax import lax
from jax.experimental import pallas as pl
from jax.experimental.pallas import tpu as pltpu

# Large-but-finite stand-in for -inf max-pool padding: avoids inf/nan when
# fully-padded halo rows flow through the bf16 matmul (they are masked out
# before they can reach any valid output pixel).
NEG_LARGE = -1.0e30
MXU_DTYPE = jnp.bfloat16          # MXU input dtype (f32 accumulation)


def _sigmoid(v):
    # exp and the approximate reciprocal both run on the EUP slot.
    return pl.reciprocal(1.0 + jnp.exp(-v), approx=True)


def _caa_kernel(x_hbm, w1a_ref, w1m_ref, b1_ref,
                hw_ref, hb_ref, vw_ref, vb_ref,
                w2_ref, b2_ref, o_ref, x_tile,
                *, C, H, W, tile_h, pool_k, h_k, v_k):
    f32 = jnp.float32
    pool_r = pool_k // 2
    h_half = h_k // 2
    v_half = v_k // 2
    halo = pool_r + v_half                 # input rows needed beyond the output tile
    in_rows = tile_h + 2 * halo            # rows of x fetched for this tile
    a_rows = tile_h + 2 * v_half           # rows carried through conv1 / h_conv
    in_hw = in_rows * W
    a_hw = a_rows * W
    t_hw = tile_h * W

    n = pl.program_id(0)
    t = pl.program_id(1)

    # ---- fetch the halo'd input slab for this tile (padded rows t*tile_h ..) ----
    pltpu.sync_copy(x_hbm.at[n, :, pl.ds(t * t_hw, in_hw)], x_tile)
    x = x_tile[...]                         # (C, in_hw) f32, spatial flat on lanes

    # (1, HW)-shaped spatial indices; jnp.where broadcasts them over sublanes.
    pow2_w = (W & (W - 1)) == 0
    w_bits = int(W).bit_length() - 1

    def col_row(num_lanes):
        p = lax.broadcasted_iota(jnp.int32, (1, num_lanes), 1)
        if pow2_w:
            return p & (W - 1), p >> w_bits
        return p % W, p // W

    def wmask(col, off):                    # True where (h, w+off) is inside the row
        return (col < W - off) if off > 0 else (col >= -off)

    col_in, row_in = col_row(in_hw)
    g_in = row_in + (t * tile_h - halo)     # original-image row index of each lane
    row_ok_in = jnp.logical_and(g_in >= 0, g_in < H)

    # ---- 7x7 avg & max pooling, stride 1, pad 3 (separable).  W pass shares
    #      rolls between sum and max; the H pass needs no masks because the
    #      halo rows already carry the correct padding data (zeros / -large). --
    sum_w, max_w = x, x
    for off in range(-pool_r, pool_r + 1):
        if off == 0:
            continue
        rolled = pltpu.roll(x, (-off) % in_hw, axis=1)
        m = wmask(col_in, off)
        sum_w = sum_w + jnp.where(m, rolled, 0.0)
        max_w = jnp.maximum(max_w, jnp.where(m, rolled, NEG_LARGE))
    # out-of-image rows must act like -inf padding for the max pool
    max_w = jnp.where(row_ok_in, max_w, NEG_LARGE)

    sum_p, max_p = sum_w, max_w
    for off in range(-pool_r, pool_r + 1):
        if off == 0:
            continue
        sum_p = sum_p + pltpu.roll(sum_w, (-off * W) % in_hw, axis=1)
        max_p = jnp.maximum(max_p, pltpu.roll(max_w, (-off * W) % in_hw, axis=1))

    # drop the pool_r boundary rows (their H pass wrapped around the tile buffer)
    a_lo = pool_r * W
    pooled_sum = sum_p[:, a_lo:a_lo + a_hw]          # (C, a_hw); 1/49 folded in w1a
    pooled_max = max_p[:, a_lo:a_lo + a_hw]

    # ---- conv1: two MXU matmuls (BN scale + 1/49 folded host-side) + SiLU ------
    a = jnp.dot(w1a_ref[...].astype(MXU_DTYPE), pooled_sum.astype(MXU_DTYPE),
                preferred_element_type=f32)
    a = a + jnp.dot(w1m_ref[...].astype(MXU_DTYPE), pooled_max.astype(MXU_DTYPE),
                    preferred_element_type=f32)
    a = a + b1_ref[...]
    a = a * _sigmoid(a)

    col_a, row_a = col_row(a_hw)
    g_a = row_a + (t * tile_h - v_half)
    row_ok_a = jnp.logical_and(g_a >= 0, g_a < H)

    # ---- h_conv: depthwise (1, h_k), zero pad (0, h_k//2), + bias --------------
    acc = a * hw_ref[h_half]                          # (C,1) tap, broadcast over lanes
    for k in range(h_k):
        if k == h_half:
            continue
        off = k - h_half
        rolled = pltpu.roll(a, (-off) % a_hw, axis=1)
        acc = acc + jnp.where(wmask(col_a, off), rolled, 0.0) * hw_ref[k]
    a = acc + hb_ref[...]

    # rows outside the image contribute zero to v_conv (its zero padding)
    a = jnp.where(row_ok_a, a, 0.0)

    # ---- v_conv: depthwise (v_k, 1), zero pad (v_k//2, 0), + bias --------------
    acc = a * vw_ref[v_half]
    for k in range(v_k):
        if k == v_half:
            continue
        off = k - v_half
        acc = acc + pltpu.roll(a, (-off * W) % a_hw, axis=1) * vw_ref[k]
    out_lo = v_half * W
    av = acc[:, out_lo:out_lo + t_hw] + vb_ref[...]   # keep only this tile's rows

    # ---- conv2: 1x1 MXU matmul (BN folded) + SiLU, then module Sigmoid ---------
    a2 = jnp.dot(w2_ref[...].astype(MXU_DTYPE), av.astype(MXU_DTYPE),
                 preferred_element_type=f32)
    a2 = a2 + b2_ref[...]
    a2 = a2 * _sigmoid(a2)
    o_ref[0] = _sigmoid(a2).astype(o_ref.dtype)       # lane-dense store


def _vmem_limit_bytes():
    cap = 128 * 1024 * 1024
    try:
        info_fn = getattr(pltpu, "get_tpu_info", None)
        if info_fn is not None:
            cap = int(getattr(info_fn(), "vmem_capacity_bytes", cap))
    except Exception:
        pass
    # Never request the full physical VMEM (v7x only has 64 MiB total).
    return min(64 * 1024 * 1024, (cap * 3) // 4)


def caa_forward(x_nchw, params, pool_k=7, tile_h=None):
    """Pallas CAA forward. x_nchw: (N, C, H, W) float32. Returns (N, C, H, W)."""
    w1, s1, b1, hw, hb, vw, vb, w2, s2, b2 = params
    N, C, H, W = x_nchw.shape
    h_k, v_k = hw.shape[1], vw.shape[1]
    pool_r, v_half = pool_k // 2, v_k // 2
    halo = pool_r + v_half

    if tile_h is None:
        # keep ~8 tile-sized f32 temporaries comfortably inside VMEM
        budget_rows = max(8, (8 * 1024 * 1024) // max(1, 8 * 4 * C * W))
        tile_h = min(H, budget_rows)
    tile_h = max(1, min(int(tile_h), H))
    n_tiles = (H + tile_h - 1) // tile_h
    Ht = n_tiles * tile_h
    Hp = Ht + 2 * halo

    # Zero-pad rows: `halo` above, `Hp - halo - H` below; the zero halo supplies
    # the avg-pool / v_conv zero padding at the image top & bottom for free.
    x = x_nchw.astype(jnp.float32)
    x_pad = jnp.pad(x, ((0, 0), (0, 0), (halo, Hp - halo - H), (0, 0)))
    x_pad = x_pad.reshape(N, C, Hp * W)               # flat spatial, stays in HBM

    # ---- host-side constant folding -------------------------------------------
    inv_area = 1.0 / float(pool_k * pool_k)
    w1a = ((s1 * w1[:, :C]) * inv_area).astype(MXU_DTYPE)   # acts on pooling *sum*
    w1m = (s1 * w1[:, C:]).astype(MXU_DTYPE)
    w2f = (s2 * w2).astype(MXU_DTYPE)
    hw_t = jnp.transpose(hw)[:, :, None]              # (h_k, C, 1)
    vw_t = jnp.transpose(vw)[:, :, None]              # (v_k, C, 1)

    kernel = functools.partial(_caa_kernel, C=C, H=H, W=W, tile_h=tile_h,
                               pool_k=pool_k, h_k=h_k, v_k=v_k)

    def full(arr):
        zeros = (0,) * arr.ndim
        return pl.BlockSpec(arr.shape, lambda n, t: zeros)

    in_rows = tile_h + 2 * halo
    grid_spec = pltpu.PrefetchScalarGridSpec(
        num_scalar_prefetch=0,
        grid=(N, n_tiles),
        in_specs=[
            pl.BlockSpec(memory_space=pl.ANY),        # x_pad: raw HBM, manual DMA
            full(w1a), full(w1m), full(b1),
            full(hw_t), full(hb), full(vw_t), full(vb),
            full(w2f), full(b2),
        ],
        out_specs=pl.BlockSpec((1, C, tile_h * W), lambda n, t: (n, 0, t)),
        scratch_shapes=[pltpu.VMEM((C, in_rows * W), jnp.float32)],
    )

    out = pl.pallas_call(
        kernel,
        out_shape=jax.ShapeDtypeStruct((N, C, Ht * W), jnp.float32),
        grid_spec=grid_spec,
        compiler_params=pltpu.CompilerParams(
            dimension_semantics=("parallel", "parallel"),
            vmem_limit_bytes=_vmem_limit_bytes(),
        ),
    )(x_pad, w1a, w1m, b1, hw_t, hb, vw_t, vb, w2f, b2)

    return out.reshape(N, C, Ht, W)[:, :, :H, :]


def init_params(key, channels, h_kernel_size=11, v_kernel_size=11, eps=1e-3):
    """Deterministic synthetic parameters; BatchNorm given as (scale, bias)."""
    C = channels
    ks = jax.random.split(key, 14)

    def bn_fold(kg, kb, km, kv):
        gamma = 1.0 + 0.1 * jax.random.normal(kg, (C, 1), jnp.float32)
        beta = 0.1 * jax.random.normal(kb, (C, 1), jnp.float32)
        mean = 0.1 * jax.random.normal(km, (C, 1), jnp.float32)
        var = 1.0 + 0.2 * jnp.abs(jax.random.normal(kv, (C, 1), jnp.float32))
        scale = gamma / jnp.sqrt(var + eps)
        bias = beta - mean * scale
        return scale, bias

    w1 = 0.2 * jax.random.normal(ks[0], (C, 2 * C), jnp.float32)  # conv1 (Cout, Cin)
    s1, b1 = bn_fold(ks[1], ks[2], ks[3], ks[4])
    hw = 0.2 * jax.random.normal(ks[5], (C, h_kernel_size), jnp.float32)
    hb = 0.1 * jax.random.normal(ks[6], (C, 1), jnp.float32)
    vw = 0.2 * jax.random.normal(ks[7], (C, v_kernel_size), jnp.float32)
    vb = 0.1 * jax.random.normal(ks[8], (C, 1), jnp.float32)
    w2 = 0.2 * jax.random.normal(ks[9], (C, C), jnp.float32)
    s2, b2 = bn_fold(ks[10], ks[11], ks[12], ks[13])
    return (w1, s1, b1, hw, hb, vw, vb, w2, s2, b2)


def caa_reference(x_nchw, params, pool_k=7):
    """Pure-JAX (f32) reference mirroring the PyTorch forward (eval mode)."""
    w1, s1, b1, hw, hb, vw, vb, w2, s2, b2 = params
    x = x_nchw.astype(jnp.float32)
    N, C, H, W = x.shape
    r = pool_k // 2
    pads = [(0, 0), (0, 0), (r, r), (r, r)]
    ssum = lax.reduce_window(x, 0.0, lax.add, (1, 1, pool_k, pool_k),
                             (1, 1, 1, 1), pads)
    avg = ssum / float(pool_k * pool_k)                # count_include_pad=True
    mx = lax.reduce_window(x, -jnp.inf, lax.max, (1, 1, pool_k, pool_k),
                           (1, 1, 1, 1), pads)
    pooled = jnp.concatenate([avg, mx], axis=1)        # (N, 2C, H, W)

    def cb(v):
        return v.reshape(1, -1, 1, 1)

    a = jnp.einsum('dc,nchw->ndhw', w1, pooled) * cb(s1) + cb(b1)
    a = a * jax.nn.sigmoid(a)
    hk, hp = hw.shape[1], hw.shape[1] // 2
    ap = jnp.pad(a, ((0, 0), (0, 0), (0, 0), (hp, hp)))
    a = sum(ap[:, :, :, k:k + W] * hw[:, k].reshape(1, C, 1, 1)
            for k in range(hk)) + cb(hb)
    vk, vp = vw.shape[1], vw.shape[1] // 2
    ap = jnp.pad(a, ((0, 0), (0, 0), (vp, vp), (0, 0)))
    a = sum(ap[:, :, k:k + H, :] * vw[:, k].reshape(1, C, 1, 1)
            for k in range(vk)) + cb(vb)
    a = jnp.einsum('dc,nchw->ndhw', w2, a) * cb(s2) + cb(b2)
    a = a * jax.nn.sigmoid(a)
    return jax.nn.sigmoid(a)


if __name__ == "__main__":
    key = jax.random.PRNGKey(0)
    kx, kp = jax.random.split(key)

    N, C, H, W = 2, 8, 16, 16
    x = jax.random.normal(kx, (N, C, H, W), jnp.float32)
    params = init_params(kp, C)
    ref = caa_reference(x, params)

    # Multi-tile path (2 spatial tiles of 8 rows, exercising the halo DMA).
    out_tiled = jax.block_until_ready(caa_forward(x, params, tile_h=8))
    # Default path (whole image in one tile).
    out_full = jax.block_until_ready(caa_forward(x, params))

    for out in (out_tiled, out_full):
        assert out.shape == (N, C, H, W), out.shape
        assert bool(jnp.all(jnp.isfinite(out)))
        max_err = float(jnp.max(jnp.abs(out - ref)))
        # bf16 MXU inputs (f32 accumulation) + approximate EUP reciprocal vs an
        # all-f32 reference: allow a few e-3 of drift on the attention map.
        if max_err > 2e-2:
            raise AssertionError(f"Pallas CAA mismatch vs reference, max_err={max_err}")

    print("KERNEL_OK")
</pallas_src>

<mosaic_0001>
module attributes {stable_mosaic.version = 11 : i64} {
  func.func @_caa_kernel(%arg0: i32, %arg1: i32, %arg2: memref<2x8x512xf32, #tpu.memory_space<any>>, %arg3: memref<8x8xbf16, #tpu.memory_space<vmem>>, %arg4: memref<8x8xbf16, #tpu.memory_space<vmem>>, %arg5: memref<8x1xf32, #tpu.memory_space<vmem>>, %arg6: memref<11x8x1xf32, #tpu.memory_space<vmem>>, %arg7: memref<8x1xf32, #tpu.memory_space<vmem>>, %arg8: memref<11x8x1xf32, #tpu.memory_space<vmem>>, %arg9: memref<8x1xf32, #tpu.memory_space<vmem>>, %arg10: memref<8x8xbf16, #tpu.memory_space<vmem>>, %arg11: memref<8x1xf32, #tpu.memory_space<vmem>>, %arg12: memref<1x8x128xf32, #tpu.memory_space<vmem>>, %arg13: memref<8x384xf32, #tpu.memory_space<vmem>>) attributes {dimension_semantics = [#tpu.dimension_semantics<parallel>, #tpu.dimension_semantics<parallel>], iteration_bounds = array<i64: 2, 2>, scalar_prefetch = 0 : i64, scratch_operands = 1 : i64, tpu.core_type = #tpu.core_type<tc>, window_params = [{}, {pipeline_mode = #tpu.pipeline_mode<synchronous>, transform_indices = @transform_1, window_bounds = array<i64: 8, 8>}, {pipeline_mode = #tpu.pipeline_mode<synchronous>, transform_indices = @transform_2, window_bounds = array<i64: 8, 8>}, {pipeline_mode = #tpu.pipeline_mode<synchronous>, transform_indices = @transform_3, window_bounds = array<i64: 8, 1>}, {pipeline_mode = #tpu.pipeline_mode<synchronous>, transform_indices = @transform_4, window_bounds = array<i64: 11, 8, 1>}, {pipeline_mode = #tpu.pipeline_mode<synchronous>, transform_indices = @transform_5, window_bounds = array<i64: 8, 1>}, {pipeline_mode = #tpu.pipeline_mode<synchronous>, transform_indices = @transform_6, window_bounds = array<i64: 11, 8, 1>}, {pipeline_mode = #tpu.pipeline_mode<synchronous>, transform_indices = @transform_7, window_bounds = array<i64: 8, 1>}, {pipeline_mode = #tpu.pipeline_mode<synchronous>, transform_indices = @transform_8, window_bounds = array<i64: 8, 8>}, {pipeline_mode = #tpu.pipeline_mode<synchronous>, transform_indices = @transform_9, window_bounds = array<i64: 8, 1>}, {transform_indices = @transform_10, window_bounds = array<i64: 1, 8, 128>}]} {
    %c128_i32 = arith.constant 128 : i32
    %0 = arith.muli %arg1, %c128_i32 : i32
    "tpu.region"() ({
      %376 = tpu.sem_alloc : memref<!tpu.dma_semaphore, #tpu.memory_space<semaphore_mem>>
      %c0_i32_139 = arith.constant 0 : i32
      %377 = tpu.memref_slice %arg2[%arg0, %c0_i32_139, %0] : memref<2x8x512xf32, #tpu.memory_space<any>> -> memref<1x8x384xf32, #tpu.memory_space<any>>
      %378 = tpu.memref_squeeze %377 : memref<1x8x384xf32, #tpu.memory_space<any>> -> memref<8x384xf32, #tpu.memory_space<any>>
      tpu.enqueue_dma source(%378 : memref<8x384xf32, #tpu.memory_space<any>>) target(%arg13 : memref<8x384xf32, #tpu.memory_space<vmem>>) target_semaphore(%376 : memref<!tpu.dma_semaphore, #tpu.memory_space<semaphore_mem>>)
      %c0_i32_140 = arith.constant 0 : i32
      %379 = tpu.memref_slice %arg2[%arg0, %c0_i32_140, %0] : memref<2x8x512xf32, #tpu.memory_space<any>> -> memref<1x8x384xf32, #tpu.memory_space<any>>
      %380 = tpu.memref_squeeze %379 : memref<1x8x384xf32, #tpu.memory_space<any>> -> memref<8x384xf32, #tpu.memory_space<any>>
      tpu.wait_dma2 semaphore(%376 : memref<!tpu.dma_semaphore, #tpu.memory_space<semaphore_mem>>) src(%380 : memref<8x384xf32, #tpu.memory_space<any>>) dst(%arg13 : memref<8x384xf32, #tpu.memory_space<vmem>>)
      tpu.yield
    }) : () -> ()
    %c0 = arith.constant 0 : index
    %c0_0 = arith.constant 0 : index
    %1 = vector.load %arg13[%c0, %c0_0] : memref<8x384xf32, #tpu.memory_space<vmem>>, vector<8x384xf32>
    %2 = tpu.iota {dimensions = array<i32: 1>} : vector<1x384xi32>
    %c15_i32 = arith.constant 15 : i32
    %3 = vector.broadcast %c15_i32 : i32 to vector<1x384xi32>
    %4 = arith.andi %2, %3 : vector<1x384xi32>
    %c4_i32 = arith.constant 4 : i32
    %5 = vector.broadcast %c4_i32 : i32 to vector<1x384xi32>
    %6 = arith.shrsi %2, %5 : vector<1x384xi32>
    %c8_i32 = arith.constant 8 : i32
    %7 = arith.muli %arg1, %c8_i32 : i32
    %c8_i32_1 = arith.constant 8 : i32
    %8 = arith.subi %7, %c8_i32_1 : i32
    %9 = vector.broadcast %8 : i32 to vector<1x384xi32>
    %10 = arith.addi %6, %9 : vector<1x384xi32>
    %c0_i32 = arith.constant 0 : i32
    %11 = vector.broadcast %c0_i32 : i32 to vector<1x384xi32>
    %12 = arith.cmpi sge, %10, %11 : vector<1x384xi32>
    %c16_i32 = arith.constant 16 : i32
    %13 = vector.broadcast %c16_i32 : i32 to vector<1x384xi32>
    %14 = arith.cmpi slt, %10, %13 : vector<1x384xi32>
    %15 = arith.andi %12, %14 : vector<1x384xi1>
    %c3_i32 = arith.constant 3 : i32
    %16 = tpu.dynamic_rotate %1 by %c3_i32 dim 1 : vector<8x384xf32>, i32 -> vector<8x384xf32>
    %c3_i32_2 = arith.constant 3 : i32
    %17 = vector.broadcast %c3_i32_2 : i32 to vector<1x384xi32>
    %18 = arith.cmpi sge, %4, %17 : vector<1x384xi32>
    %cst = arith.constant 0.000000e+00 : f32
    %19 = vector.shape_cast %18 : vector<1x384xi1> to vector<1x384xi1>
    %20 = vector.broadcast %19 : vector<1x384xi1> to vector<8x384xi1>
    %21 = vector.broadcast %cst : f32 to vector<8x384xf32>
    %22 = arith.select %20, %16, %21 : vector<8x384xi1>, vector<8x384xf32>
    %23 = arith.addf %1, %22 : vector<8x384xf32>
    %cst_3 = arith.constant -1.000000e+30 : f32
    %24 = vector.shape_cast %18 : vector<1x384xi1> to vector<1x384xi1>
    %25 = vector.broadcast %24 : vector<1x384xi1> to vector<8x384xi1>
    %26 = vector.broadcast %cst_3 : f32 to vector<8x384xf32>
    %27 = arith.select %25, %16, %26 : vector<8x384xi1>, vector<8x384xf32>
    %28 = arith.maximumf %1, %27 : vector<8x384xf32>
    %c2_i32 = arith.constant 2 : i32
    %29 = tpu.dynamic_rotate %1 by %c2_i32 dim 1 : vector<8x384xf32>, i32 -> vector<8x384xf32>
    %c2_i32_4 = arith.constant 2 : i32
    %30 = vector.broadcast %c2_i32_4 : i32 to vector<1x384xi32>
    %31 = arith.cmpi sge, %4, %30 : vector<1x384xi32>
    %cst_5 = arith.constant 0.000000e+00 : f32
    %32 = vector.shape_cast %31 : vector<1x384xi1> to vector<1x384xi1>
    %33 = vector.broadcast %32 : vector<1x384xi1> to vector<8x384xi1>
    %34 = vector.broadcast %cst_5 : f32 to vector<8x384xf32>
    %35 = arith.select %33, %29, %34 : vector<8x384xi1>, vector<8x384xf32>
    %36 = arith.addf %23, %35 : vector<8x384xf32>
    %cst_6 = arith.constant -1.000000e+30 : f32
    %37 = vector.shape_cast %31 : vector<1x384xi1> to vector<1x384xi1>
    %38 = vector.broadcast %37 : vector<1x384xi1> to vector<8x384xi1>
    %39 = vector.broadcast %cst_6 : f32 to vector<8x384xf32>
    %40 = arith.select %38, %29, %39 : vector<8x384xi1>, vector<8x384xf32>
    %41 = arith.maximumf %28, %40 : vector<8x384xf32>
    %c1_i32 = arith.constant 1 : i32
    %42 = tpu.dynamic_rotate %1 by %c1_i32 dim 1 : vector<8x384xf32>, i32 -> vector<8x384xf32>
    %c1_i32_7 = arith.constant 1 : i32
    %43 = vector.broadcast %c1_i32_7 : i32 to vector<1x384xi32>
    %44 = arith.cmpi sge, %4, %43 : vector<1x384xi32>
    %cst_8 = arith.constant 0.000000e+00 : f32
    %45 = vector.shape_cast %44 : vector<1x384xi1> to vector<1x384xi1>
    %46 = vector.broadcast %45 : vector<1x384xi1> to vector<8x384xi1>
    %47 = vector.broadcast %cst_8 : f32 to vector<8x384xf32>
    %48 = arith.select %46, %42, %47 : vector<8x384xi1>, vector<8x384xf32>
    %49 = arith.addf %36, %48 : vector<8x384xf32>
    %cst_9 = arith.constant -1.000000e+30 : f32
    %50 = vector.shape_cast %44 : vector<1x384xi1> to vector<1x384xi1>
    %51 = vector.broadcast %50 : vector<1x384xi1> to vector<8x384xi1>
    %52 = vector.broadcast %cst_9 : f32 to vector<8x384xf32>
    %53 = arith.select %51, %42, %52 : vector<8x384xi1>, vector<8x384xf32>
    %54 = arith.maximumf %41, %53 : vector<8x384xf32>
    %c383_i32 = arith.constant 383 : i32
    %55 = tpu.dynamic_rotate %1 by %c383_i32 dim 1 : vector<8x384xf32>, i32 -> vector<8x384xf32>
    %c15_i32_10 = arith.constant 15 : i32
    %56 = vector.broadcast %c15_i32_10 : i32 to vector<1x384xi32>
    %57 = arith.cmpi slt, %4, %56 : vector<1x384xi32>
    %cst_11 = arith.constant 0.000000e+00 : f32
    %58 = vector.shape_cast %57 : vector<1x384xi1> to vector<1x384xi1>
    %59 = vector.broadcast %58 : vector<1x384xi1> to vector<8x384xi1>
    %60 = vector.broadcast %cst_11 : f32 to vector<8x384xf32>
    %61 = arith.select %59, %55, %60 : vector<8x384xi1>, vector<8x384xf32>
    %62 = arith.addf %49, %61 : vector<8x384xf32>
    %cst_12 = arith.constant -1.000000e+30 : f32
    %63 = vector.shape_cast %57 : vector<1x384xi1> to vector<1x384xi1>
    %64 = vector.broadcast %63 : vector<1x384xi1> to vector<8x384xi1>
    %65 = vector.broadcast %cst_12 : f32 to vector<8x384xf32>
    %66 = arith.select %64, %55, %65 : vector<8x384xi1>, vector<8x384xf32>
    %67 = arith.maximumf %54, %66 : vector<8x384xf32>
    %c382_i32 = arith.constant 382 : i32
    %68 = tpu.dynamic_rotate %1 by %c382_i32 dim 1 : vector<8x384xf32>, i32 -> vector<8x384xf32>
    %c14_i32 = arith.constant 14 : i32
    %69 = vector.broadcast %c14_i32 : i32 to vector<1x384xi32>
    %70 = arith.cmpi slt, %4, %69 : vector<1x384xi32>
    %cst_13 = arith.constant 0.000000e+00 : f32
    %71 = vector.shape_cast %70 : vector<1x384xi1> to vector<1x384xi1>
    %72 = vector.broadcast %71 : vector<1x384xi1> to vector<8x384xi1>
    %73 = vector.broadcast %cst_13 : f32 to vector<8x384xf32>
    %74 = arith.select %72, %68, %73 : vector<8x384xi1>, vector<8x384xf32>
    %75 = arith.addf %62, %74 : vector<8x384xf32>
    %cst_14 = arith.constant -1.000000e+30 : f32
    %76 = vector.shape_cast %70 : vector<1x384xi1> to vector<1x384xi1>
    %77 = vector.broadcast %76 : vector<1x384xi1> to vector<8x384xi1>
    %78 = vector.broadcast %cst_14 : f32 to vector<8x384xf32>
    %79 = arith.select %77, %68, %78 : vector<8x384xi1>, vector<8x384xf32>
    %80 = arith.maximumf %67, %79 : vector<8x384xf32>
    %c381_i32 = arith.constant 381 : i32
    %81 = tpu.dynamic_rotate %1 by %c381_i32 dim 1 : vector<8x384xf32>, i32 -> vector<8x384xf32>
    %c13_i32 = arith.constant 13 : i32
    %82 = vector.broadcast %c13_i32 : i32 to vector<1x384xi32>
    %83 = arith.cmpi slt, %4, %82 : vector<1x384xi32>
    %cst_15 = arith.constant 0.000000e+00 : f32
    %84 = vector.shape_cast %83 : vector<1x384xi1> to vector<1x384xi1>
    %85 = vector.broadcast %84 : vector<1x384xi1> to vector<8x384xi1>
    %86 = vector.broadcast %cst_15 : f32 to vector<8x384xf32>
    %87 = arith.select %85, %81, %86 : vector<8x384xi1>, vector<8x384xf32>
    %88 = arith.addf %75, %87 : vector<8x384xf32>
    %cst_16 = arith.constant -1.000000e+30 : f32
    %89 = vector.shape_cast %83 : vector<1x384xi1> to vector<1x384xi1>
    %90 = vector.broadcast %89 : vector<1x384xi1> to vector<8x384xi1>
    %91 = vector.broadcast %cst_16 : f32 to vector<8x384xf32>
    %92 = arith.select %90, %81, %91 : vector<8x384xi1>, vector<8x384xf32>
    %93 = arith.maximumf %80, %92 : vector<8x384xf32>
    %cst_17 = arith.constant -1.000000e+30 : f32
    %94 = vector.shape_cast %15 : vector<1x384xi1> to vector<1x384xi1>
    %95 = vector.broadcast %94 : vector<1x384xi1> to vector<8x384xi1>
    %96 = vector.broadcast %cst_17 : f32 to vector<8x384xf32>
    %97 = arith.select %95, %93, %96 : vector<8x384xi1>, vector<8x384xf32>
    %c48_i32 = arith.constant 48 : i32
    %98 = tpu.dynamic_rotate %88 by %c48_i32 dim 1 : vector<8x384xf32>, i32 -> vector<8x384xf32>
    %99 = arith.addf %88, %98 : vector<8x384xf32>
    %c48_i32_18 = arith.constant 48 : i32
    %100 = tpu.dynamic_rotate %97 by %c48_i32_18 dim 1 : vector<8x384xf32>, i32 -> vector<8x384xf32>
    %101 = arith.maximumf %97, %100 : vector<8x384xf32>
    %c32_i32 = arith.constant 32 : i32
    %102 = tpu.dynamic_rotate %88 by %c32_i32 dim 1 : vector<8x384xf32>, i32 -> vector<8x384xf32>
    %103 = arith.addf %99, %102 : vector<8x384xf32>
    %c32_i32_19 = arith.constant 32 : i32
    %104 = tpu.dynamic_rotate %97 by %c32_i32_19 dim 1 : vector<8x384xf32>, i32 -> vector<8x384xf32>
    %105 = arith.maximumf %101, %104 : vector<8x384xf32>
    %c16_i32_20 = arith.constant 16 : i32
    %106 = tpu.dynamic_rotate %88 by %c16_i32_20 dim 1 : vector<8x384xf32>, i32 -> vector<8x384xf32>
    %107 = arith.addf %103, %106 : vector<8x384xf32>
    %c16_i32_21 = arith.constant 16 : i32
    %108 = tpu.dynamic_rotate %97 by %c16_i32_21 dim 1 : vector<8x384xf32>, i32 -> vector<8x384xf32>
    %109 = arith.maximumf %105, %108 : vector<8x384xf32>
    %c368_i32 = arith.constant 368 : i32
    %110 = tpu.dynamic_rotate %88 by %c368_i32 dim 1 : vector<8x384xf32>, i32 -> vector<8x384xf32>
    %111 = arith.addf %107, %110 : vector<8x384xf32>
    %c368_i32_22 = arith.constant 368 : i32
    %112 = tpu.dynamic_rotate %97 by %c368_i32_22 dim 1 : vector<8x384xf32>, i32 -> vector<8x384xf32>
    %113 = arith.maximumf %109, %112 : vector<8x384xf32>
    %c352_i32 = arith.constant 352 : i32
    %114 = tpu.dynamic_rotate %88 by %c352_i32 dim 1 : vector<8x384xf32>, i32 -> vector<8x384xf32>
    %115 = arith.addf %111, %114 : vector<8x384xf32>
    %c352_i32_23 = arith.constant 352 : i32
    %116 = tpu.dynamic_rotate %97 by %c352_i32_23 dim 1 : vector<8x384xf32>, i32 -> vector<8x384xf32>
    %117 = arith.maximumf %113, %116 : vector<8x384xf32>
    %c336_i32 = arith.constant 336 : i32
    %118 = tpu.dynamic_rotate %88 by %c336_i32 dim 1 : vector<8x384xf32>, i32 -> vector<8x384xf32>
    %119 = arith.addf %115, %118 : vector<8x384xf32>
    %c336_i32_24 = arith.constant 336 : i32
    %120 = tpu.dynamic_rotate %97 by %c336_i32_24 dim 1 : vector<8x384xf32>, i32 -> vector<8x384xf32>
    %121 = arith.maximumf %117, %120 : vector<8x384xf32>
    %122 = vector.extract_strided_slice %119 {offsets = [0, 48], sizes = [8, 288], strides = [1, 1]} : vector<8x384xf32> to vector<8x288xf32>
    %123 = vector.extract_strided_slice %121 {offsets = [0, 48], sizes = [8, 288], strides = [1, 1]} : vector<8x384xf32> to vector<8x288xf32>
    %c0_25 = arith.constant 0 : index
    %c0_26 = arith.constant 0 : index
    %124 = vector.load %arg3[%c0_25, %c0_26] : memref<8x8xbf16, #tpu.memory_space<vmem>>, vector<8x8xbf16>
    %125 = arith.truncf %122 : vector<8x288xf32> to vector<8x288xbf16>
    %cst_27 = arith.constant dense<0.000000e+00> : vector<8x288xf32>
    %126 = tpu.matmul %124, %125, %cst_27 {dimension_numbers = #tpu.dot_dimension_numbers<[1], [0], [0], [1], [0, 0, 1, 1], [], []>} : vector<8x8xbf16>, vector<8x288xbf16>, vector<8x288xf32> -> vector<8x288xf32>
    %c0_28 = arith.constant 0 : index
    %c0_29 = arith.constant 0 : index
    %127 = vector.load %arg4[%c0_28, %c0_29] : memref<8x8xbf16, #tpu.memory_space<vmem>>, vector<8x8xbf16>
    %128 = arith.truncf %123 : vector<8x288xf32> to vector<8x288xbf16>
    %cst_30 = arith.constant dense<0.000000e+00> : vector<8x288xf32>
    %129 = tpu.matmul %127, %128, %cst_30 {dimension_numbers = #tpu.dot_dimension_numbers<[1], [0], [0], [1], [0, 0, 1, 1], [], []>} : vector<8x8xbf16>, vector<8x288xbf16>, vector<8x288xf32> -> vector<8x288xf32>
    %130 = arith.addf %126, %129 : vector<8x288xf32>
    %c0_31 = arith.constant 0 : index
    %c0_32 = arith.constant 0 : index
    %131 = vector.load %arg5[%c0_31, %c0_32] : memref<8x1xf32, #tpu.memory_space<vmem>>, vector<8x1xf32>
    %132 = vector.broadcast %131 : vector<8x1xf32> to vector<8x288xf32>
    %133 = arith.addf %130, %132 : vector<8x288xf32>
    %cst_33 = arith.constant 0.000000e+00 : f32
    %134 = vector.broadcast %cst_33 : f32 to vector<8x288xf32>
    %135 = arith.subf %134, %133 : vector<8x288xf32>
    %136 = math.exp %135 : vector<8x288xf32>
    %cst_34 = arith.constant 1.000000e+00 : f32
    %137 = vector.broadcast %cst_34 : f32 to vector<8x288xf32>
    %138 = arith.addf %137, %136 : vector<8x288xf32>
    %139 = tpu.reciprocal %138 {approx = true} : vector<8x288xf32> -> vector<8x288xf32>
    %140 = arith.mulf %133, %139 : vector<8x288xf32>
    %141 = tpu.iota {dimensions = array<i32: 1>} : vector<1x288xi32>
    %c15_i32_35 = arith.constant 15 : i32
    %142 = vector.broadcast %c15_i32_35 : i32 to vector<1x288xi32>
    %143 = arith.andi %141, %142 : vector<1x288xi32>
    %c4_i32_36 = arith.constant 4 : i32
    %144 = vector.broadcast %c4_i32_36 : i32 to vector<1x288xi32>
    %145 = arith.shrsi %141, %144 : vector<1x288xi32>
    %c8_i32_37 = arith.constant 8 : i32
    %146 = arith.muli %arg1, %c8_i32_37 : i32
    %c5_i32 = arith.constant 5 : i32
    %147 = arith.subi %146, %c5_i32 : i32
    %148 = vector.broadcast %147 : i32 to vector<1x288xi32>
    %149 = arith.addi %145, %148 : vector<1x288xi32>
    %c0_i32_38 = arith.constant 0 : i32
    %150 = vector.broadcast %c0_i32_38 : i32 to vector<1x288xi32>
    %151 = arith.cmpi sge, %149, %150 : vector<1x288xi32>
    %c16_i32_39 = arith.constant 16 : i32
    %152 = vector.broadcast %c16_i32_39 : i32 to vector<1x288xi32>
    %153 = arith.cmpi slt, %149, %152 : vector<1x288xi32>
    %154 = arith.andi %151, %153 : vector<1x288xi1>
    %c5 = arith.constant 5 : index
    %c0_40 = arith.constant 0 : index
    %c0_41 = arith.constant 0 : index
    %155 = vector.load %arg6[%c5, %c0_40, %c0_41] : memref<11x8x1xf32, #tpu.memory_space<vmem>>, vector<1x8x1xf32>
    %156 = vector.shape_cast %155 : vector<1x8x1xf32> to vector<8x1xf32>
    %157 = vector.broadcast %156 : vector<8x1xf32> to vector<8x288xf32>
    %158 = arith.mulf %140, %157 : vector<8x288xf32>
    %c5_i32_42 = arith.constant 5 : i32
    %159 = tpu.dynamic_rotate %140 by %c5_i32_42 dim 1 : vector<8x288xf32>, i32 -> vector<8x288xf32>
    %c5_i32_43 = arith.constant 5 : i32
    %160 = vector.broadcast %c5_i32_43 : i32 to vector<1x288xi32>
    %161 = arith.cmpi sge, %143, %160 : vector<1x288xi32>
    %cst_44 = arith.constant 0.000000e+00 : f32
    %162 = vector.shape_cast %161 : vector<1x288xi1> to vector<1x288xi1>
    %163 = vector.broadcast %162 : vector<1x288xi1> to vector<8x288xi1>
    %164 = vector.broadcast %cst_44 : f32 to vector<8x288xf32>
    %165 = arith.select %163, %159, %164 : vector<8x288xi1>, vector<8x288xf32>
    %c0_45 = arith.constant 0 : index
    %c0_46 = arith.constant 0 : index
    %c0_47 = arith.constant 0 : index
    %166 = vector.load %arg6[%c0_45, %c0_46, %c0_47] : memref<11x8x1xf32, #tpu.memory_space<vmem>>, vector<1x8x1xf32>
    %167 = vector.shape_cast %166 : vector<1x8x1xf32> to vector<8x1xf32>
    %168 = vector.broadcast %167 : vector<8x1xf32> to vector<8x288xf32>
    %169 = arith.mulf %165, %168 : vector<8x288xf32>
    %170 = arith.addf %158, %169 : vector<8x288xf32>
    %c4_i32_48 = arith.constant 4 : i32
    %171 = tpu.dynamic_rotate %140 by %c4_i32_48 dim 1 : vector<8x288xf32>, i32 -> vector<8x288xf32>
    %c4_i32_49 = arith.constant 4 : i32
    %172 = vector.broadcast %c4_i32_49 : i32 to vector<1x288xi32>
    %173 = arith.cmpi sge, %143, %172 : vector<1x288xi32>
    %cst_50 = arith.constant 0.000000e+00 : f32
    %174 = vector.shape_cast %173 : vector<1x288xi1> to vector<1x288xi1>
    %175 = vector.broadcast %174 : vector<1x288xi1> to vector<8x288xi1>
    %176 = vector.broadcast %cst_50 : f32 to vector<8x288xf32>
    %177 = arith.select %175, %171, %176 : vector<8x288xi1>, vector<8x288xf32>
    %c1 = arith.constant 1 : index
    %c0_51 = arith.constant 0 : index
    %c0_52 = arith.constant 0 : index
    %178 = vector.load %arg6[%c1, %c0_51, %c0_52] : memref<11x8x1xf32, #tpu.memory_space<vmem>>, vector<1x8x1xf32>
    %179 = vector.shape_cast %178 : vector<1x8x1xf32> to vector<8x1xf32>
    %180 = vector.broadcast %179 : vector<8x1xf32> to vector<8x288xf32>
    %181 = arith.mulf %177, %180 : vector<8x288xf32>
    %182 = arith.addf %170, %181 : vector<8x288xf32>
    %c3_i32_53 = arith.constant 3 : i32
    %183 = tpu.dynamic_rotate %140 by %c3_i32_53 dim 1 : vector<8x288xf32>, i32 -> vector<8x288xf32>
    %c3_i32_54 = arith.constant 3 : i32
    %184 = vector.broadcast %c3_i32_54 : i32 to vector<1x288xi32>
    %185 = arith.cmpi sge, %143, %184 : vector<1x288xi32>
    %cst_55 = arith.constant 0.000000e+00 : f32
    %186 = vector.shape_cast %185 : vector<1x288xi1> to vector<1x288xi1>
    %187 = vector.broadcast %186 : vector<1x288xi1> to vector<8x288xi1>
    %188 = vector.broadcast %cst_55 : f32 to vector<8x288xf32>
    %189 = arith.select %187, %183, %188 : vector<8x288xi1>, vector<8x288xf32>
    %c2 = arith.constant 2 : index
    %c0_56 = arith.constant 0 : index
    %c0_57 = arith.constant 0 : index
    %190 = vector.load %arg6[%c2, %c0_56, %c0_57] : memref<11x8x1xf32, #tpu.memory_space<vmem>>, vector<1x8x1xf32>
    %191 = vector.shape_cast %190 : vector<1x8x1xf32> to vector<8x1xf32>
    %192 = vector.broadcast %191 : vector<8x1xf32> to vector<8x288xf32>
    %193 = arith.mulf %189, %192 : vector<8x288xf32>
    %194 = arith.addf %182, %193 : vector<8x288xf32>
    %c2_i32_58 = arith.constant 2 : i32
    %195 = tpu.dynamic_rotate %140 by %c2_i32_58 dim 1 : vector<8x288xf32>, i32 -> vector<8x288xf32>
    %c2_i32_59 = arith.constant 2 : i32
    %196 = vector.broadcast %c2_i32_59 : i32 to vector<1x288xi32>
    %197 = arith.cmpi sge, %143, %196 : vector<1x288xi32>
    %cst_60 = arith.constant 0.000000e+00 : f32
    %198 = vector.shape_cast %197 : vector<1x288xi1> to vector<1x288xi1>
    %199 = vector.broadcast %198 : vector<1x288xi1> to vector<8x288xi1>
    %200 = vector.broadcast %cst_60 : f32 to vector<8x288xf32>
    %201 = arith.select %199, %195, %200 : vector<8x288xi1>, vector<8x288xf32>
    %c3 = arith.constant 3 : index
    %c0_61 = arith.constant 0 : index
    %c0_62 = arith.constant 0 : index
    %202 = vector.load %arg6[%c3, %c0_61, %c0_62] : memref<11x8x1xf32, #tpu.memory_space<vmem>>, vector<1x8x1xf32>
    %203 = vector.shape_cast %202 : vector<1x8x1xf32> to vector<8x1xf32>
    %204 = vector.broadcast %203 : vector<8x1xf32> to vector<8x288xf32>
    %205 = arith.mulf %201, %204 : vector<8x288xf32>
    %206 = arith.addf %194, %205 : vector<8x288xf32>
    %c1_i32_63 = arith.constant 1 : i32
    %207 = tpu.dynamic_rotate %140 by %c1_i32_63 dim 1 : vector<8x288xf32>, i32 -> vector<8x288xf32>
    %c1_i32_64 = arith.constant 1 : i32
    %208 = vector.broadcast %c1_i32_64 : i32 to vector<1x288xi32>
    %209 = arith.cmpi sge, %143, %208 : vector<1x288xi32>
    %cst_65 = arith.constant 0.000000e+00 : f32
    %210 = vector.shape_cast %209 : vector<1x288xi1> to vector<1x288xi1>
    %211 = vector.broadcast %210 : vector<1x288xi1> to vector<8x288xi1>
    %212 = vector.broadcast %cst_65 : f32 to vector<8x288xf32>
    %213 = arith.select %211, %207, %212 : vector<8x288xi1>, vector<8x288xf32>
    %c4 = arith.constant 4 : index
    %c0_66 = arith.constant 0 : index
    %c0_67 = arith.constant 0 : index
    %214 = vector.load %arg6[%c4, %c0_66, %c0_67] : memref<11x8x1xf32, #tpu.memory_space<vmem>>, vector<1x8x1xf32>
    %215 = vector.shape_cast %214 : vector<1x8x1xf32> to vector<8x1xf32>
    %216 = vector.broadcast %215 : vector<8x1xf32> to vector<8x288xf32>
    %217 = arith.mulf %213, %216 : vector<8x288xf32>
    %218 = arith.addf %206, %217 : vector<8x288xf32>
    %c287_i32 = arith.constant 287 : i32
    %219 = tpu.dynamic_rotate %140 by %c287_i32 dim 1 : vector<8x288xf32>, i32 -> vector<8x288xf32>
    %c15_i32_68 = arith.constant 15 : i32
    %220 = vector.broadcast %c15_i32_68 : i32 to vector<1x288xi32>
    %221 = arith.cmpi slt, %143, %220 : vector<1x288xi32>
    %cst_69 = arith.constant 0.000000e+00 : f32
    %222 = vector.shape_cast %221 : vector<1x288xi1> to vector<1x288xi1>
    %223 = vector.broadcast %222 : vector<1x288xi1> to vector<8x288xi1>
    %224 = vector.broadcast %cst_69 : f32 to vector<8x288xf32>
    %225 = arith.select %223, %219, %224 : vector<8x288xi1>, vector<8x288xf32>
    %c6 = arith.constant 6 : index
    %c0_70 = arith.constant 0 : index
    %c0_71 = arith.constant 0 : index
    %226 = vector.load %arg6[%c6, %c0_70, %c0_71] : memref<11x8x1xf32, #tpu.memory_space<vmem>>, vector<1x8x1xf32>
    %227 = vector.shape_cast %226 : vector<1x8x1xf32> to vector<8x1xf32>
    %228 = vector.broadcast %227 : vector<8x1xf32> to vector<8x288xf32>
    %229 = arith.mulf %225, %228 : vector<8x288xf32>
    %230 = arith.addf %218, %229 : vector<8x288xf32>
    %c286_i32 = arith.constant 286 : i32
    %231 = tpu.dynamic_rotate %140 by %c286_i32 dim 1 : vector<8x288xf32>, i32 -> vector<8x288xf32>
    %c14_i32_72 = arith.constant 14 : i32
    %232 = vector.broadcast %c14_i32_72 : i32 to vector<1x288xi32>
    %233 = arith.cmpi slt, %143, %232 : vector<1x288xi32>
    %cst_73 = arith.constant 0.000000e+00 : f32
    %234 = vector.shape_cast %233 : vector<1x288xi1> to vector<1x288xi1>
    %235 = vector.broadcast %234 : vector<1x288xi1> to vector<8x288xi1>
    %236 = vector.broadcast %cst_73 : f32 to vector<8x288xf32>
    %237 = arith.select %235, %231, %236 : vector<8x288xi1>, vector<8x288xf32>
    %c7 = arith.constant 7 : index
    %c0_74 = arith.constant 0 : index
    %c0_75 = arith.constant 0 : index
    %238 = vector.load %arg6[%c7, %c0_74, %c0_75] : memref<11x8x1xf32, #tpu.memory_space<vmem>>, vector<1x8x1xf32>
    %239 = vector.shape_cast %238 : vector<1x8x1xf32> to vector<8x1xf32>
    %240 = vector.broadcast %239 : vector<8x1xf32> to vector<8x288xf32>
    %241 = arith.mulf %237, %240 : vector<8x288xf32>
    %242 = arith.addf %230, %241 : vector<8x288xf32>
    %c285_i32 = arith.constant 285 : i32
    %243 = tpu.dynamic_rotate %140 by %c285_i32 dim 1 : vector<8x288xf32>, i32 -> vector<8x288xf32>
    %c13_i32_76 = arith.constant 13 : i32
    %244 = vector.broadcast %c13_i32_76 : i32 to vector<1x288xi32>
    %245 = arith.cmpi slt, %143, %244 : vector<1x288xi32>
    %cst_77 = arith.constant 0.000000e+00 : f32
    %246 = vector.shape_cast %245 : vector<1x288xi1> to vector<1x288xi1>
    %247 = vector.broadcast %246 : vector<1x288xi1> to vector<8x288xi1>
    %248 = vector.broadcast %cst_77 : f32 to vector<8x288xf32>
    %249 = arith.select %247, %243, %248 : vector<8x288xi1>, vector<8x288xf32>
    %c8 = arith.constant 8 : index
    %c0_78 = arith.constant 0 : index
    %c0_79 = arith.constant 0 : index
    %250 = vector.load %arg6[%c8, %c0_78, %c0_79] : memref<11x8x1xf32, #tpu.memory_space<vmem>>, vector<1x8x1xf32>
    %251 = vector.shape_cast %250 : vector<1x8x1xf32> to vector<8x1xf32>
    %252 = vector.broadcast %251 : vector<8x1xf32> to vector<8x288xf32>
    %253 = arith.mulf %249, %252 : vector<8x288xf32>
    %254 = arith.addf %242, %253 : vector<8x288xf32>
    %c284_i32 = arith.constant 284 : i32
    %255 = tpu.dynamic_rotate %140 by %c284_i32 dim 1 : vector<8x288xf32>, i32 -> vector<8x288xf32>
    %c12_i32 = arith.constant 12 : i32
    %256 = vector.broadcast %c12_i32 : i32 to vector<1x288xi32>
    %257 = arith.cmpi slt, %143, %256 : vector<1x288xi32>
    %cst_80 = arith.constant 0.000000e+00 : f32
    %258 = vector.shape_cast %257 : vector<1x288xi1> to vector<1x288xi1>
    %259 = vector.broadcast %258 : vector<1x288xi1> to vector<8x288xi1>
    %260 = vector.broadcast %cst_80 : f32 to vector<8x288xf32>
    %261 = arith.select %259, %255, %260 : vector<8x288xi1>, vector<8x288xf32>
    %c9 = arith.constant 9 : index
    %c0_81 = arith.constant 0 : index
    %c0_82 = arith.constant 0 : index
    %262 = vector.load %arg6[%c9, %c0_81, %c0_82] : memref<11x8x1xf32, #tpu.memory_space<vmem>>, vector<1x8x1xf32>
    %263 = vector.shape_cast %262 : vector<1x8x1xf32> to vector<8x1xf32>
    %264 = vector.broadcast %263 : vector<8x1xf32> to vector<8x288xf32>
    %265 = arith.mulf %261, %264 : vector<8x288xf32>
    %266 = arith.addf %254, %265 : vector<8x288xf32>
    %c283_i32 = arith.constant 283 : i32
    %267 = tpu.dynamic_rotate %140 by %c283_i32 dim 1 : vector<8x288xf32>, i32 -> vector<8x288xf32>
    %c11_i32 = arith.constant 11 : i32
    %268 = vector.broadcast %c11_i32 : i32 to vector<1x288xi32>
    %269 = arith.cmpi slt, %143, %268 : vector<1x288xi32>
    %cst_83 = arith.constant 0.000000e+00 : f32
    %270 = vector.shape_cast %269 : vector<1x288xi1> to vector<1x288xi1>
    %271 = vector.broadcast %270 : vector<1x288xi1> to vector<8x288xi1>
    %272 = vector.broadcast %cst_83 : f32 to vector<8x288xf32>
    %273 = arith.select %271, %267, %272 : vector<8x288xi1>, vector<8x288xf32>
    %c10 = arith.constant 10 : index
    %c0_84 = arith.constant 0 : index
    %c0_85 = arith.constant 0 : index
    %274 = vector.load %arg6[%c10, %c0_84, %c0_85] : memref<11x8x1xf32, #tpu.memory_space<vmem>>, vector<1x8x1xf32>
    %275 = vector.shape_cast %274 : vector<1x8x1xf32> to vector<8x1xf32>
    %276 = vector.broadcast %275 : vector<8x1xf32> to vector<8x288xf32>
    %277 = arith.mulf %273, %276 : vector<8x288xf32>
    %278 = arith.addf %266, %277 : vector<8x288xf32>
    %c0_86 = arith.constant 0 : index
    %c0_87 = arith.constant 0 : index
    %279 = vector.load %arg7[%c0_86, %c0_87] : memref<8x1xf32, #tpu.memory_space<vmem>>, vector<8x1xf32>
    %280 = vector.broadcast %279 : vector<8x1xf32> to vector<8x288xf32>
    %281 = arith.addf %278, %280 : vector<8x288xf32>
    %cst_88 = arith.constant 0.000000e+00 : f32
    %282 = vector.shape_cast %154 : vector<1x288xi1> to vector<1x288xi1>
    %283 = vector.broadcast %282 : vector<1x288xi1> to vector<8x288xi1>
    %284 = vector.broadcast %cst_88 : f32 to vector<8x288xf32>
    %285 = arith.select %283, %281, %284 : vector<8x288xi1>, vector<8x288xf32>
    %c5_89 = arith.constant 5 : index
    %c0_90 = arith.constant 0 : index
    %c0_91 = arith.constant 0 : index
    %286 = vector.load %arg8[%c5_89, %c0_90, %c0_91] : memref<11x8x1xf32, #tpu.memory_space<vmem>>, vector<1x8x1xf32>
    %287 = vector.shape_cast %286 : vector<1x8x1xf32> to vector<8x1xf32>
    %288 = vector.broadcast %287 : vector<8x1xf32> to vector<8x288xf32>
    %289 = arith.mulf %285, %288 : vector<8x288xf32>
    %c80_i32 = arith.constant 80 : i32
    %290 = tpu.dynamic_rotate %285 by %c80_i32 dim 1 : vector<8x288xf32>, i32 -> vector<8x288xf32>
    %c0_92 = arith.constant 0 : index
    %c0_93 = arith.constant 0 : index
    %c0_94 = arith.constant 0 : index
    %291 = vector.load %arg8[%c0_92, %c0_93, %c0_94] : memref<11x8x1xf32, #tpu.memory_space<vmem>>, vector<1x8x1xf32>
    %292 = vector.shape_cast %291 : vector<1x8x1xf32> to vector<8x1xf32>
    %293 = vector.broadcast %292 : vector<8x1xf32> to vector<8x288xf32>
    %294 = arith.mulf %290, %293 : vector<8x288xf32>
    %295 = arith.addf %289, %294 : vector<8x288xf32>
    %c64_i32 = arith.constant 64 : i32
    %296 = tpu.dynamic_rotate %285 by %c64_i32 dim 1 : vector<8x288xf32>, i32 -> vector<8x288xf32>
    %c1_95 = arith.constant 1 : index
    %c0_96 = arith.constant 0 : index
    %c0_97 = arith.constant 0 : index
    %297 = vector.load %arg8[%c1_95, %c0_96, %c0_97] : memref<11x8x1xf32, #tpu.memory_space<vmem>>, vector<1x8x1xf32>
    %298 = vector.shape_cast %297 : vector<1x8x1xf32> to vector<8x1xf32>
    %299 = vector.broadcast %298 : vector<8x1xf32> to vector<8x288xf32>
    %300 = arith.mulf %296, %299 : vector<8x288xf32>
    %301 = arith.addf %295, %300 : vector<8x288xf32>
    %c48_i32_98 = arith.constant 48 : i32
    %302 = tpu.dynamic_rotate %285 by %c48_i32_98 dim 1 : vector<8x288xf32>, i32 -> vector<8x288xf32>
    %c2_99 = arith.constant 2 : index
    %c0_100 = arith.constant 0 : index
    %c0_101 = arith.constant 0 : index
    %303 = vector.load %arg8[%c2_99, %c0_100, %c0_101] : memref<11x8x1xf32, #tpu.memory_space<vmem>>, vector<1x8x1xf32>
    %304 = vector.shape_cast %303 : vector<1x8x1xf32> to vector<8x1xf32>
    %305 = vector.broadcast %304 : vector<8x1xf32> to vector<8x288xf32>
    %306 = arith.mulf %302, %305 : vector<8x288xf32>
    %307 = arith.addf %301, %306 : vector<8x288xf32>
    %c32_i32_102 = arith.constant 32 : i32
    %308 = tpu.dynamic_rotate %285 by %c32_i32_102 dim 1 : vector<8x288xf32>, i32 -> vector<8x288xf32>
    %c3_103 = arith.constant 3 : index
    %c0_104 = arith.constant 0 : index
    %c0_105 = arith.constant 0 : index
    %309 = vector.load %arg8[%c3_103, %c0_104, %c0_105] : memref<11x8x1xf32, #tpu.memory_space<vmem>>, vector<1x8x1xf32>
    %310 = vector.shape_cast %309 : vector<1x8x1xf32> to vector<8x1xf32>
    %311 = vector.broadcast %310 : vector<8x1xf32> to vector<8x288xf32>
    %312 = arith.mulf %308, %311 : vector<8x288xf32>
    %313 = arith.addf %307, %312 : vector<8x288xf32>
    %c16_i32_106 = arith.constant 16 : i32
    %314 = tpu.dynamic_rotate %285 by %c16_i32_106 dim 1 : vector<8x288xf32>, i32 -> vector<8x288xf32>
    %c4_107 = arith.constant 4 : index
    %c0_108 = arith.constant 0 : index
    %c0_109 = arith.constant 0 : index
    %315 = vector.load %arg8[%c4_107, %c0_108, %c0_109] : memref<11x8x1xf32, #tpu.memory_space<vmem>>, vector<1x8x1xf32>
    %316 = vector.shape_cast %315 : vector<1x8x1xf32> to vector<8x1xf32>
    %317 = vector.broadcast %316 : vector<8x1xf32> to vector<8x288xf32>
    %318 = arith.mulf %314, %317 : vector<8x288xf32>
    %319 = arith.addf %313, %318 : vector<8x288xf32>
    %c272_i32 = arith.constant 272 : i32
    %320 = tpu.dynamic_rotate %285 by %c272_i32 dim 1 : vector<8x288xf32>, i32 -> vector<8x288xf32>
    %c6_110 = arith.constant 6 : index
    %c0_111 = arith.constant 0 : index
    %c0_112 = arith.constant 0 : index
    %321 = vector.load %arg8[%c6_110, %c0_111, %c0_112] : memref<11x8x1xf32, #tpu.memory_space<vmem>>, vector<1x8x1xf32>
    %322 = vector.shape_cast %321 : vector<1x8x1xf32> to vector<8x1xf32>
    %323 = vector.broadcast %322 : vector<8x1xf32> to vector<8x288xf32>
    %324 = arith.mulf %320, %323 : vector<8x288xf32>
    %325 = arith.addf %319, %324 : vector<8x288xf32>
    %c256_i32 = arith.constant 256 : i32
    %326 = tpu.dynamic_rotate %285 by %c256_i32 dim 1 : vector<8x288xf32>, i32 -> vector<8x288xf32>
    %c7_113 = arith.constant 7 : index
    %c0_114 = arith.constant 0 : index
    %c0_115 = arith.constant 0 : index
    %327 = vector.load %arg8[%c7_113, %c0_114, %c0_115] : memref<11x8x1xf32, #tpu.memory_space<vmem>>, vector<1x8x1xf32>
    %328 = vector.shape_cast %327 : vector<1x8x1xf32> to vector<8x1xf32>
    %329 = vector.broadcast %328 : vector<8x1xf32> to vector<8x288xf32>
    %330 = arith.mulf %326, %329 : vector<8x288xf32>
    %331 = arith.addf %325, %330 : vector<8x288xf32>
    %c240_i32 = arith.constant 240 : i32
    %332 = tpu.dynamic_rotate %285 by %c240_i32 dim 1 : vector<8x288xf32>, i32 -> vector<8x288xf32>
    %c8_116 = arith.constant 8 : index
    %c0_117 = arith.constant 0 : index
    %c0_118 = arith.constant 0 : index
    %333 = vector.load %arg8[%c8_116, %c0_117, %c0_118] : memref<11x8x1xf32, #tpu.memory_space<vmem>>, vector<1x8x1xf32>
    %334 = vector.shape_cast %333 : vector<1x8x1xf32> to vector<8x1xf32>
    %335 = vector.broadcast %334 : vector<8x1xf32> to vector<8x288xf32>
    %336 = arith.mulf %332, %335 : vector<8x288xf32>
    %337 = arith.addf %331, %336 : vector<8x288xf32>
    %c224_i32 = arith.constant 224 : i32
    %338 = tpu.dynamic_rotate %285 by %c224_i32 dim 1 : vector<8x288xf32>, i32 -> vector<8x288xf32>
    %c9_119 = arith.constant 9 : index
    %c0_120 = arith.constant 0 : index
    %c0_121 = arith.constant 0 : index
    %339 = vector.load %arg8[%c9_119, %c0_120, %c0_121] : memref<11x8x1xf32, #tpu.memory_space<vmem>>, vector<1x8x1xf32>
    %340 = vector.shape_cast %339 : vector<1x8x1xf32> to vector<8x1xf32>
    %341 = vector.broadcast %340 : vector<8x1xf32> to vector<8x288xf32>
    %342 = arith.mulf %338, %341 : vector<8x288xf32>
    %343 = arith.addf %337, %342 : vector<8x288xf32>
    %c208_i32 = arith.constant 208 : i32
    %344 = tpu.dynamic_rotate %285 by %c208_i32 dim 1 : vector<8x288xf32>, i32 -> vector<8x288xf32>
    %c10_122 = arith.constant 10 : index
    %c0_123 = arith.constant 0 : index
    %c0_124 = arith.constant 0 : index
    %345 = vector.load %arg8[%c10_122, %c0_123, %c0_124] : memref<11x8x1xf32, #tpu.memory_space<vmem>>, vector<1x8x1xf32>
    %346 = vector.shape_cast %345 : vector<1x8x1xf32> to vector<8x1xf32>
    %347 = vector.broadcast %346 : vector<8x1xf32> to vector<8x288xf32>
    %348 = arith.mulf %344, %347 : vector<8x288xf32>
    %349 = arith.addf %343, %348 : vector<8x288xf32>
    %350 = vector.extract_strided_slice %349 {offsets = [0, 80], sizes = [8, 128], strides = [1, 1]} : vector<8x288xf32> to vector<8x128xf32>
    %c0_125 = arith.constant 0 : index
    %c0_126 = arith.constant 0 : index
    %351 = vector.load %arg9[%c0_125, %c0_126] : memref<8x1xf32, #tpu.memory_space<vmem>>, vector<8x1xf32>
    %352 = vector.broadcast %351 : vector<8x1xf32> to vector<8x128xf32>
    %353 = arith.addf %350, %352 : vector<8x128xf32>
    %c0_127 = arith.constant 0 : index
    %c0_128 = arith.constant 0 : index
    %354 = vector.load %arg10[%c0_127, %c0_128] : memref<8x8xbf16, #tpu.memory_space<vmem>>, vector<8x8xbf16>
    %355 = arith.truncf %353 : vector<8x128xf32> to vector<8x128xbf16>
    %cst_129 = arith.constant dense<0.000000e+00> : vector<8x128xf32>
    %356 = tpu.matmul %354, %355, %cst_129 {dimension_numbers = #tpu.dot_dimension_numbers<[1], [0], [0], [1], [0, 0, 1, 1], [], []>} : vector<8x8xbf16>, vector<8x128xbf16>, vector<8x128xf32> -> vector<8x128xf32>
    %c0_130 = arith.constant 0 : index
    %c0_131 = arith.constant 0 : index
    %357 = vector.load %arg11[%c0_130, %c0_131] : memref<8x1xf32, #tpu.memory_space<vmem>>, vector<8x1xf32>
    %358 = vector.broadcast %357 : vector<8x1xf32> to vector<8x128xf32>
    %359 = arith.addf %356, %358 : vector<8x128xf32>
    %cst_132 = arith.constant 0.000000e+00 : f32
    %360 = vector.broadcast %cst_132 : f32 to vector<8x128xf32>
    %361 = arith.subf %360, %359 : vector<8x128xf32>
    %362 = math.exp %361 : vector<8x128xf32>
    %cst_133 = arith.constant 1.000000e+00 : f32
    %363 = vector.broadcast %cst_133 : f32 to vector<8x128xf32>
    %364 = arith.addf %363, %362 : vector<8x128xf32>
    %365 = tpu.reciprocal %364 {approx = true} : vector<8x128xf32> -> vector<8x128xf32>
    %366 = arith.mulf %359, %365 : vector<8x128xf32>
    %cst_134 = arith.constant 0.000000e+00 : f32
    %367 = vector.broadcast %cst_134 : f32 to vector<8x128xf32>
    %368 = arith.subf %367, %366 : vector<8x128xf32>
    %369 = math.exp %368 : vector<8x128xf32>
    %cst_135 = arith.constant 1.000000e+00 : f32
    %370 = vector.broadcast %cst_135 : f32 to vector<8x128xf32>
    %371 = arith.addf %370, %369 : vector<8x128xf32>
    %372 = tpu.reciprocal %371 {approx = true} : vector<8x128xf32> -> vector<8x128xf32>
    %c0_136 = arith.constant 0 : index
    %c0_137 = arith.constant 0 : index
    %c0_138 = arith.constant 0 : index
    %373 = vector.load %arg12[%c0_136, %c0_137, %c0_138] : memref<1x8x128xf32, #tpu.memory_space<vmem>>, vector<1x8x128xf32>
    %374 = vector.shape_cast %373 : vector<1x8x128xf32> to vector<8x128xf32>
    %375 = vector.shape_cast %372 : vector<8x128xf32> to vector<1x8x128xf32>
    tpu.vector_store %arg12[%c0_136, %c0_137, %c0_138], %375 {strides = array<i32>} : memref<1x8x128xf32, #tpu.memory_space<vmem>>, vector<1x8x128xf32>,
    return
  }
  func.func @transform_1(%arg0: i32, %arg1: i32) -> (i32, i32) {
    %c0_i32 = arith.constant 0 : i32
    %c0_i32_0 = arith.constant 0 : i32
    %c0_i32_1 = arith.constant 0 : i32
    return %c0_i32, %c0_i32_0 : i32, i32
  }
  func.func @transform_2(%arg0: i32, %arg1: i32) -> (i32, i32) {
    %c0_i32 = arith.constant 0 : i32
    %c0_i32_0 = arith.constant 0 : i32
    %c0_i32_1 = arith.constant 0 : i32
    return %c0_i32, %c0_i32_0 : i32, i32
  }
  func.func @transform_3(%arg0: i32, %arg1: i32) -> (i32, i32) {
    %c0_i32 = arith.constant 0 : i32
    %c0_i32_0 = arith.constant 0 : i32
    %c0_i32_1 = arith.constant 0 : i32
    return %c0_i32, %c0_i32_0 : i32, i32
  }
  func.func @transform_4(%arg0: i32, %arg1: i32) -> (i32, i32, i32) {
    %c0_i32 = arith.constant 0 : i32
    %c0_i32_0 = arith.constant 0 : i32
    %c0_i32_1 = arith.constant 0 : i32
    %c0_i32_2 = arith.constant 0 : i32
    return %c0_i32, %c0_i32_0, %c0_i32_1 : i32, i32, i32
  }
  func.func @transform_5(%arg0: i32, %arg1: i32) -> (i32, i32) {
    %c0_i32 = arith.constant 0 : i32
    %c0_i32_0 = arith.constant 0 : i32
    %c0_i32_1 = arith.constant 0 : i32
    return %c0_i32, %c0_i32_0 : i32, i32
  }
  func.func @transform_6(%arg0: i32, %arg1: i32) -> (i32, i32, i32) {
    %c0_i32 = arith.constant 0 : i32
    %c0_i32_0 = arith.constant 0 : i32
    %c0_i32_1 = arith.constant 0 : i32
    %c0_i32_2 = arith.constant 0 : i32
    return %c0_i32, %c0_i32_0, %c0_i32_1 : i32, i32, i32
  }
  func.func @transform_7(%arg0: i32, %arg1: i32) -> (i32, i32) {
    %c0_i32 = arith.constant 0 : i32
    %c0_i32_0 = arith.constant 0 : i32
    %c0_i32_1 = arith.constant 0 : i32
    return %c0_i32, %c0_i32_0 : i32, i32
  }
  func.func @transform_8(%arg0: i32, %arg1: i32) -> (i32, i32) {
    %c0_i32 = arith.constant 0 : i32
    %c0_i32_0 = arith.constant 0 : i32
    %c0_i32_1 = arith.constant 0 : i32
    return %c0_i32, %c0_i32_0 : i32, i32
  }
  func.func @transform_9(%arg0: i32, %arg1: i32) -> (i32, i32) {
    %c0_i32 = arith.constant 0 : i32
    %c0_i32_0 = arith.constant 0 : i32
    %c0_i32_1 = arith.constant 0 : i32
    return %c0_i32, %c0_i32_0 : i32, i32
  }
  func.func @transform_10(%arg0: i32, %arg1: i32) -> (i32, i32, i32) {
    %c0_i32 = arith.constant 0 : i32
    %c0_i32_0 = arith.constant 0 : i32
    return %arg0, %c0_i32, %arg1 : i32, i32, i32
  }
}

</mosaic_0001>

<bundles_post_ra>
// kernel: tpu_custom_call.1
= control target key start
LH: loop header
LB: loop body
LE: loop exit
PB: predicated region body
PF: predicated region fallthrough
CT: control target
= control target key end

     0   :  { %s3939_s0 = inlined_call_operand.hbm [shape: f32[2,8,512], index: 0, kind: input, shape index: {}]   ;;  %s3940_s1 = inlined_call_operand.hbm [shape: bf16[8,8], index: 1, kind: input, shape index: {}]   ;;  %s3941_s2 = inlined_call_operand.hbm [shape: bf16[8,8], index: 2, kind: input, shape index: {}]   ;;  %s3942_s3 = inlined_call_operand.hbm [shape: f32[8,1], index: 3, kind: input, shape index: {}]   ;;  %s3943_s4 = inlined_call_operand.hbm [shape: f32[11,8,1], index: 4, kind: input, shape index: {}]   ;;  %s3944_s5 = inlined_call_operand.hbm [shape: f32[8,1], index: 5, kind: input, shape index: {}]   ;;  %s3945_s6 = inlined_call_operand.hbm [shape: f32[11,8,1], index: 6, kind: input, shape index: {}]   ;;  %s3946_s7 = inlined_call_operand.hbm [shape: f32[8,1], index: 7, kind: input, shape index: {}]   ;;  %s3947_s8 = inlined_call_operand.hbm [shape: bf16[8,8], index: 8, kind: input, shape index: {}]   ;;  %s3948_s9 = inlined_call_operand.hbm [shape: f32[8,1], index: 9, kind: input, shape index: {}]   ;;  %s3949_s10 = inlined_call_operand.hbm [shape: f32[2,8,256], index: 10, kind: output, shape index: {}]  }
   0x1   :  { %3986 = sst [smem:[#allocation41_spill]] %s3939_s0 }
   0x2   :  { %3987 = sst [smem:[#allocation42_spill]] %s3941_s2 }
   0x3   :  { %3988 = sst [smem:[#allocation43_spill]] %s3949_s10 }
   0x4   :  { %15 = vsyncpa [#allocation4], 0 }
   0x5   :  { %16 = vsyncpa [#allocation7], 0 }
   0x6   :  { %17 = vsyncpa [#allocation10], 0 }
   0x7   :  { %18 = vsyncpa [#allocation13], 0 }
   0x8   :  { %19 = vsyncpa [#allocation16], 0 }
   0x9   :  { %20 = vsyncpa [#allocation5], 0 }
   0xa   :  { %22 = vsyncpa [#allocation5 + $0x1], 0  ;;  %s2758_s13 = smov 0   ;;  %s2760_s14 = smov 0  }
   0xb   :  { %s2762_s15 = smov 0   ;;  %s2764_s16 = smov 0  }
   0xc   :  { %s2766_s17 = smov 0   ;;  %s2768_s18 = smov 0  }
   0xd   :  { %s2770_s19 = smov 0   ;;  %s2772_s20 = smov 0  }
   0xe LB: > { %3989 = sst [smem:[#allocation31_spill]] %s2637_s13  ;;  %s1968_s21 = sadd.s32 4294967295, %s2665_s20   ;;  %s2665_s20 = sphi %s2772_s20, %s28_s20   ;;  %s2661_s19 = sphi %s2770_s19, %s4047_s19   ;;  %s2657_s18 = sphi %s2768_s18, %s4046_s18   ;;  %s2653_s17 = sphi %s2766_s17, %s4045_s17   ;;  %s2649_s16 = sphi %s2764_s16, %s4044_s16   ;;  %s2645_s15 = sphi %s2762_s15, %s4043_s15   ;;  %s2641_s14 = sphi %s2760_s14, %s4049_s14   ;;  %s2637_s13 = sphi %s2758_s13, %s4048_s13  }
   0xf   : > { %3990 = sst [smem:[#allocation32_spill]] %s2645_s15  ;;  %s1969_s22 = sadd.s32 4294967294, %s2665_s20  }
  0x10   : > { %3991 = sst [smem:[#allocation33_spill]] %s2657_s18  ;;  %s37_s23 = sadd.s32 1, %s2657_s18 }
  0x11   : > { %3992 = sst [smem:[#allocation34_spill]] %s2661_s19  ;;  %s40_s24 = sadd.s32 1, %s2661_s19 }
  0x12   : > { %3993 = sst [smem:[#allocation35_spill]] %s2665_s20  ;;  %p38_p0 = scmp.ge.s32.totalorder %s37_s23, 2 }
  0x13   : > { %s238_s25 = sadd.s32 1, %s2645_s15  ;;  %p248_p1 = scmp.ne.s32.totalorder %s2645_s15, %s2641_s14 }
  0x14   : > { %p249_p2 = scmp.eq.s32.totalorder %s1968_s21, 3  ;;  %s4051_s23 = smov (%p38_p0, %s37_s23), 0 }
  0x15   : > { %3994 = sst [smem:[#allocation36_spill]] %s4051_s23  ;;  %s4053_s24 = smov (!%p38_p0, %s40_s24), %s2661_s19 }
  0x16   : > { %s234_s26 = ssub.s32 %s2657_s18, %s4051_s23  ;;  %p2810_p3 = por %p249_p2, %p248_p1 }
  0x17   : > { %p42_p4 = scmp.ge.s32.totalorder %s4053_s24, 2  ;;  %p254_p5 = scmp.ne.s32.totalorder %s2641_s14, %s2637_s13 }
  0x18   : > { %s3995_s27 = scalar_select %p2810_p3, 1, 0 }
  0x19   : > { %p255_p6 = scmp.eq.s32.totalorder %s1969_s22, 3  ;;  %p1970_p7 = scmp.ge.s32.totalorder %s2665_s20, 1 }
  0x1a   : > { %3996 = sst [smem:[#allocation37_spill]] %s3995_s27  ;;  %s4055_s24 = smov (%p42_p4, %s4053_s24), 0 }
  0x1b   : > { %3997 = sst [smem:[#allocation38_spill]] %s4055_s24  ;;  %p2819_p8 = por %p255_p6, %p254_p5 }
  0x1c   : > { %p262_p9 = scmp.lt.s32.totalorder %s2665_s20, 5  ;;  %s233_s29 = ssub.s32 %s2661_s19, %s4055_s24 }
  0x1d   : > { %s3998_s28 = scalar_select %p2819_p8, 1, 0 }
  0x1e   : > { %s235_s30 = sor.u32 %s234_s26, %s233_s29  ;;  %p2826_p10 = pnand %p1970_p7, %p262_p9 }
  0x1f   : > { %3999 = sst [smem:[#allocation39_spill]] %s3998_s28  ;;  %p236_p11 = scmp.eq.s32.totalorder %s235_s30, 0 }
  0x20   : > { %s4000_s11 = scalar_select %p2826_p10, 1, 0 }
  0x21   : > { %p2830_p12 = scmp.eq.s32.totalorder %s1968_s21, 0  ;;  %p2071_p13 = pneg %p2826_p10 }
  0x22   : > { %s2837_s22 = scalar_select %p236_p11, %s2645_s15, %s238_s25  }
  0x23   : > { %s4001_s12 = scalar_select %p2830_p12, 1, 0 }
  0x24   : > { %4002 = sst [smem:[#allocation40_spill]] %s2837_s22  ;;  %p2841_p0 = pnand %p2830_p12, %p2071_p13 }
  0x25   : > { %s2667_s26 = smov [#allocation6]   ;;  %s2668_s24 = smov [#allocation9]  }
  0x26   : > { %s286_s29 = sshll.u32 %s2667_s26, 4  ;;  %s307_s30 = sshll.u32 %s2668_s24, 4  ;;  %s287_s29 = int_to_ptr.vmem [resolvable:$true] %s286_s29  ;;  %s308_s30 = int_to_ptr.vmem [resolvable:$true] %s307_s30 }
  0x27   : > { %s4004_s2 = sld [smem:[#allocation42_spill]]  ;;  %p2853_p2 = pneg %p2841_p0 }
  0x2d   : > { %s2273_s18 = scalar_lea.hbm %s4004_s2, 64 }
  0x2e   : > { %p2274_p1 = scmp.ne.s32.totalorder %s4004_s2, %s2273_s18  ;;  %p2280_p6 = scmp.lt.u32.totalorder %s2273_s18, %s4004_s2 }
  0x30   : > { %p2276_p4 = pnand %p2853_p2, %p2274_p1 }
  0x32   : > { %p2277_p5 = pneg %p2276_p4 }
  0x34   : > { %p2282_p7 = pnand %p2280_p6, %p2277_p5 }
  0x36   : > { %2285 = shalt.err (!%p2282_p7)
}
  0x37   : > { %s2286_s19 = scalar_lea.vmem %s287_s29, 64  ;;  %p2294_p8 = scmp.lt.s32.totalorder %s287_s29, %s287_s29 }
  0x38   : > { %p2287_p9 = scmp.ne.s32.totalorder %s287_s29, %s2286_s19  ;;  %p2295_p3 = scmp.lt.s32.totalorder %s2286_s19, %s2286_s19 }
  0x3a   : > { %p2289_p11 = pnand %p2287_p9, %p2853_p2  ;;  %p2296_p12 = por %p2295_p3, %p2294_p8 }
  0x3c   : > { %p2290_p13 = pneg %p2289_p11 }
  0x3e   : > { %p2297_p10 = pnand %p2296_p12, %p2290_p13 }
  0x40   : > { %2300 = shalt.err (!%p2297_p10)
}
  0x41   : > { %2077 = dma.hbm_to_vmem [thread:$0]  (!%p2841_p0), %s4004_s2, 64, %s287_s29, [#allocation7]  }
  0x42   : > { %s2301_s22 = scalar_lea.hbm %s3943_s4, 1408 }
  0x43   : > { %p2302_p1 = scmp.ne.s32.totalorder %s3943_s4, %s2301_s22  ;;  %p2308_p10 = scmp.lt.u32.totalorder %s2301_s22, %s3943_s4 }
  0x45   : > { %p2304_p3 = pnand %p2302_p1, %p2853_p2 }
  0x47   : > { %p2305_p8 = pneg %p2304_p3 }
  0x49   : > { %p2310_p12 = pnand %p2308_p10, %p2305_p8 }
  0x4b   : > { %2313 = shalt.err (!%p2310_p12)
}
  0x4c   : > { %s2314_s13 = scalar_lea.vmem %s308_s30, 1408  ;;  %p2322_p7 = scmp.lt.s32.totalorder %s308_s30, %s308_s30 }
  0x4d   : > { %p2315_p4 = scmp.ne.s32.totalorder %s308_s30, %s2314_s13  ;;  %p2323_p9 = scmp.lt.s32.totalorder %s2314_s13, %s2314_s13 }
  0x4f   : > { %p2317_p5 = pnand %p2315_p4, %p2853_p2  ;;  %p2324_p11 = por %p2323_p9, %p2322_p7 }
  0x51   : > { %p2318_p6 = pneg %p2317_p5 }
  0x53   : > { %p2325_p13 = pnand %p2324_p11, %p2318_p6 }
  0x55   : > { %2328 = shalt.err (!%p2325_p13)
}
  0x56   : > { %s2669_s29 = smov 128   ;;  %s2670_s24 = smov 8  }
  0x57   : > { %2083 = dma.hbm_to_vmem [thread:$0]  (!%p2841_p0), %s3943_s4, 1408, %s308_s30, [#allocation10], %s2669_s29, %s2669_s29, %s2670_s24  }
  0x58   : > { %s2671_s28 = smov [#allocation12]   ;;  %s2672_s21 = smov [#allocation15]  }
  0x59   : > { %s331_s22 = sshll.u32 %s2671_s28, 4  ;;  %s356_s26 = sshll.u32 %s2672_s21, 4  ;;  %s332_s22 = int_to_ptr.vmem [resolvable:$true] %s331_s22  ;;  %s357_s26 = int_to_ptr.vmem [resolvable:$true] %s356_s26 }
  0x5a   : > { %s2329_s13 = scalar_lea.hbm %s3945_s6, 1408 }
  0x5b   : > { %p2330_p1 = scmp.ne.s32.totalorder %s3945_s6, %s2329_s13  ;;  %p2336_p10 = scmp.lt.u32.totalorder %s2329_s13, %s3945_s6 }
  0x5d   : > { %p2332_p3 = pnand %p2330_p1, %p2853_p2 }
  0x5f   : > { %p2333_p8 = pneg %p2332_p3 }
  0x61   : > { %p2338_p12 = pnand %p2336_p10, %p2333_p8 }
  0x63   : > { %2341 = shalt.err (!%p2338_p12)
}
  0x64   : > { %s2342_s30 = scalar_lea.vmem %s332_s22, 1408  ;;  %p2350_p7 = scmp.lt.s32.totalorder %s332_s22, %s332_s22 }
  0x65   : > { %p2343_p4 = scmp.ne.s32.totalorder %s332_s22, %s2342_s30  ;;  %p2351_p9 = scmp.lt.s32.totalorder %s2342_s30, %s2342_s30 }
  0x67   : > { %p2345_p5 = pnand %p2343_p4, %p2853_p2  ;;  %p2352_p11 = por %p2351_p9, %p2350_p7 }
  0x69   : > { %p2346_p6 = pneg %p2345_p5 }
  0x6b   : > { %p2353_p13 = pnand %p2352_p11, %p2346_p6 }
  0x6d   : > { %2356 = shalt.err (!%p2353_p13)
}
  0x6e   : > { %2089 = dma.hbm_to_vmem [thread:$0]  (!%p2841_p0), %s3945_s6, 1408, %s332_s22, [#allocation13], %s2669_s29, %s2669_s29, %s2670_s24  }
  0x6f   : > { %s2357_s27 = scalar_lea.hbm %s3947_s8, 64 }
  0x70   : > { %p2358_p1 = scmp.ne.s32.totalorder %s3947_s8, %s2357_s27  ;;  %p2364_p10 = scmp.lt.u32.totalorder %s2357_s27, %s3947_s8 }
  0x72   : > { %p2360_p3 = pnand %p2358_p1, %p2853_p2 }
  0x74   : > { %p2361_p8 = pneg %p2360_p3 }
  0x76   : > { %p2366_p12 = pnand %p2364_p10, %p2361_p8 }
  0x78   : > { %2369 = shalt.err (!%p2366_p12)
}
  0x79   : > { %s2370_s19 = scalar_lea.vmem %s357_s26, 64  ;;  %p2378_p7 = scmp.lt.s32.totalorder %s357_s26, %s357_s26 }
  0x7a   : > { %p2371_p4 = scmp.ne.s32.totalorder %s357_s26, %s2370_s19  ;;  %p2379_p9 = scmp.lt.s32.totalorder %s2370_s19, %s2370_s19 }
  0x7c   : > { %p2373_p5 = pnand %p2371_p4, %p2853_p2  ;;  %p2380_p11 = por %p2379_p9, %p2378_p7 }
  0x7e   : > { %p2374_p6 = pneg %p2373_p5 }
  0x80   : > { %p2381_p13 = pnand %p2380_p11, %p2374_p6 }
  0x82   : > { %2384 = shalt.err (!%p2381_p13)
}
  0x83   : > { %2095 = dma.hbm_to_vmem [thread:$0]  (!%p2841_p0), %s3947_s8, 64, %s357_s26, [#allocation16]  }
  0x84   : > { %s2673_s22 = smov [#allocation3]   ;;  %s2674_s30 = smov [#allocation8]  }
  0x85   : > { %s275_s13 = sshll.u32 %s2673_s22, 4  ;;  %s297_s2 = sshll.u32 %s2674_s30, 4  ;;  %s276_s13 = int_to_ptr.vmem [resolvable:$true] %s275_s13  ;;  %s298_s2 = int_to_ptr.vmem [resolvable:$true] %s297_s2 }
  0x86   : > { %s2385_s20 = scalar_lea.hbm %s3940_s1, 64 }
  0x87   : > { %p2386_p1 = scmp.ne.s32.totalorder %s3940_s1, %s2385_s20  ;;  %p2392_p10 = scmp.lt.u32.totalorder %s2385_s20, %s3940_s1 }
  0x89   : > { %p2388_p3 = pnand %p2386_p1, %p2853_p2 }
  0x8b   : > { %p2389_p8 = pneg %p2388_p3 }
  0x8d   : > { %p2394_p12 = pnand %p2392_p10, %p2389_p8 }
  0x8f   : > { %2397 = shalt.err (!%p2394_p12)
}
  0x90   : > { %s2398_s26 = scalar_lea.vmem %s276_s13, 64  ;;  %p2406_p7 = scmp.lt.s32.totalorder %s276_s13, %s276_s13 }
  0x91   : > { %p2399_p4 = scmp.ne.s32.totalorder %s276_s13, %s2398_s26  ;;  %p2407_p9 = scmp.lt.s32.totalorder %s2398_s26, %s2398_s26 }
  0x93   : > { %p2401_p5 = pnand %p2399_p4, %p2853_p2  ;;  %p2408_p11 = por %p2407_p9, %p2406_p7 }
  0x95   : > { %p2402_p6 = pneg %p2401_p5 }
  0x97   : > { %p2409_p13 = pnand %p2408_p11, %p2402_p6 }
  0x99   : > { %2412 = shalt.err (!%p2409_p13)
}
  0x9a   : > { %2074 = dma.hbm_to_vmem [thread:$0]  (!%p2841_p0), %s3940_s1, 64, %s276_s13, [#allocation4]  }
  0x9b   : > { %s2413_s22 = scalar_lea.hbm %s3942_s3, 128 }
  0x9c   : > { %p2414_p1 = scmp.ne.s32.totalorder %s3942_s3, %s2413_s22  ;;  %p2420_p10 = scmp.lt.u32.totalorder %s2413_s22, %s3942_s3 }
  0x9e   : > { %p2416_p3 = pnand %p2414_p1, %p2853_p2 }
  0xa0   : > { %p2417_p8 = pneg %p2416_p3 }
  0xa2   : > { %p2422_p12 = pnand %p2420_p10, %p2417_p8 }
  0xa4   : > { %2425 = shalt.err (!%p2422_p12)
}
  0xa5   : > { %s2426_s27 = scalar_lea.vmem %s298_s2, 128  ;;  %p2434_p7 = scmp.lt.s32.totalorder %s298_s2, %s298_s2 }
  0xa6   : > { %p2427_p4 = scmp.ne.s32.totalorder %s298_s2, %s2426_s27  ;;  %p2435_p9 = scmp.lt.s32.totalorder %s2426_s27, %s2426_s27 }
  0xa8   : > { %p2429_p5 = pnand %p2427_p4, %p2853_p2  ;;  %p2436_p11 = por %p2435_p9, %p2434_p7 }
  0xaa   : > { %p2430_p6 = pneg %p2429_p5 }
  0xac   : > { %p2437_p13 = pnand %p2436_p11, %p2430_p6 }
  0xae   : > { %2440 = shalt.err (!%p2437_p13)
}
  0xaf   : > { %2080 = dma.hbm_to_vmem [thread:$0]  (!%p2841_p0), %s3942_s3, 128, %s298_s2, [#allocation7]  }
  0xb0   : > { %s2675_s18 = smov [#allocation11]   ;;  %s2676_s26 = smov [#allocation14]  }
  0xb1   : > { %s321_s28 = sshll.u32 %s2675_s18, 4  ;;  %s345_s21 = sshll.u32 %s2676_s26, 4  ;;  %s322_s28 = int_to_ptr.vmem [resolvable:$true] %s321_s28  ;;  %s346_s21 = int_to_ptr.vmem [resolvable:$true] %s345_s21 }
  0xb2   : > { %s2441_s24 = scalar_lea.hbm %s3944_s5, 128 }
  0xb3   : > { %p2442_p1 = scmp.ne.s32.totalorder %s3944_s5, %s2441_s24  ;;  %p2448_p10 = scmp.lt.u32.totalorder %s2441_s24, %s3944_s5 }
  0xb5   : > { %p2444_p3 = pnand %p2442_p1, %p2853_p2 }
  0xb7   : > { %p2445_p8 = pneg %p2444_p3 }
  0xb9   : > { %p2450_p12 = pnand %p2448_p10, %p2445_p8 }
  0xbb   : > { %2453 = shalt.err (!%p2450_p12)
}
  0xbc   : > { %s2454_s2 = scalar_lea.vmem %s322_s28, 128  ;;  %p2462_p7 = scmp.lt.s32.totalorder %s322_s28, %s322_s28 }
  0xbd   : > { %p2455_p4 = scmp.ne.s32.totalorder %s322_s28, %s2454_s2  ;;  %p2463_p9 = scmp.lt.s32.totalorder %s2454_s2, %s2454_s2 }
  0xbf   : > { %p2457_p5 = pnand %p2455_p4, %p2853_p2  ;;  %p2464_p11 = por %p2463_p9, %p2462_p7 }
  0xc1   : > { %p2458_p6 = pneg %p2457_p5 }
  0xc3   : > { %p2465_p13 = pnand %p2464_p11, %p2458_p6 }
  0xc5   : > { %2468 = shalt.err (!%p2465_p13)
}
  0xc6   : > { %2086 = dma.hbm_to_vmem [thread:$0]  (!%p2841_p0), %s3944_s5, 128, %s322_s28, [#allocation10]  }
  0xc7   : > { %s2469_s18 = scalar_lea.hbm %s3946_s7, 128 }
  0xc8   : > { %p2470_p1 = scmp.ne.s32.totalorder %s3946_s7, %s2469_s18  ;;  %p2476_p10 = scmp.lt.u32.totalorder %s2469_s18, %s3946_s7 }
  0xca   : > { %p2472_p3 = pnand %p2470_p1, %p2853_p2 }
  0xcc   : > { %p2473_p8 = pneg %p2472_p3 }
  0xce   : > { %p2478_p12 = pnand %p2476_p10, %p2473_p8 }
  0xd0   : > { %2481 = shalt.err (!%p2478_p12)
}
  0xd1   : > { %s2482_s22 = scalar_lea.vmem %s346_s21, 128  ;;  %p2490_p7 = scmp.lt.s32.totalorder %s346_s21, %s346_s21 }
  0xd2   : > { %p2483_p4 = scmp.ne.s32.totalorder %s346_s21, %s2482_s22  ;;  %p2491_p9 = scmp.lt.s32.totalorder %s2482_s22, %s2482_s22 }
  0xd4   : > { %p2485_p5 = pnand %p2483_p4, %p2853_p2  ;;  %p2492_p11 = por %p2491_p9, %p2490_p7 }
  0xd6   : > { %p2486_p6 = pneg %p2485_p5 }
  0xd8   : > { %p2493_p13 = pnand %p2492_p11, %p2486_p6 }
  0xda   : > { %2496 = shalt.err (!%p2493_p13)
}
  0xdb   : > { %2092 = dma.hbm_to_vmem [thread:$0]  (!%p2841_p0), %s3946_s7, 128, %s346_s21, [#allocation13]  }
  0xdc   : > { %s2677_s10 = smov [#allocation17]   ;;  %s2497_s27 = scalar_lea.hbm %s3948_s9, 128 }
  0xdd   : > { %s367_s0 = sshll.u32 %s2677_s10, 4  ;;  %p2498_p1 = scmp.ne.s32.totalorder %s3948_s9, %s2497_s27  ;;  %s368_s0 = int_to_ptr.vmem [resolvable:$true] %s367_s0 }
  0xde   : > { %p2504_p10 = scmp.lt.u32.totalorder %s2497_s27, %s3948_s9 }
  0xdf   : > { %p2500_p3 = pnand %p2498_p1, %p2853_p2 }
  0xe1   : > { %p2501_p8 = pneg %p2500_p3 }
  0xe3   : > { %p2506_p12 = pnand %p2504_p10, %p2501_p8 }
  0xe5   : > { %2509 = shalt.err (!%p2506_p12)
}
  0xe6   : > { %s2510_s21 = scalar_lea.vmem %s368_s0, 128  ;;  %p2518_p7 = scmp.lt.s32.totalorder %s368_s0, %s368_s0 }
  0xe7   : > { %p2511_p4 = scmp.ne.s32.totalorder %s368_s0, %s2510_s21  ;;  %p2519_p9 = scmp.lt.s32.totalorder %s2510_s21, %s2510_s21 }
  0xe9   : > { %p2513_p5 = pnand %p2511_p4, %p2853_p2  ;;  %p2520_p11 = por %p2519_p9, %p2518_p7 }
  0xeb   : > { %p2514_p6 = pneg %p2513_p5 }
  0xed   : > { %p2521_p13 = pnand %p2520_p11, %p2514_p6 }
  0xef   : > { %2524 = shalt.err (!%p2521_p13)
}
  0xf0   : > { %2098 = dma.hbm_to_vmem [thread:$0]  (!%p2841_p0), %s3948_s9, 128, %s368_s0, [#allocation16]  }
  0xf1   : > { %p4006_p1 = scmp.ne.s32.totalorder %s4000_s11, 0 }
  0xf2   : > { %p4007_p3 = scmp.ne.s32.totalorder (!%p4006_p1), %s4001_s12, 0 }
  0xf3   : > { %380 = sbr.rel (%p4006_p1) target bundleno = 2080 (0x820), region = 56 }
  0xfa   : > { %2610 = dma.done.wait (%p4007_p3), [#allocation4], 64  }
  0xfb   : > { %2612 = vsyncadd (%p4007_p3), [#allocation4], 4294967232 }
  0xfc   : > { %2614 = dma.done.wait (%p4007_p3), [#allocation7], 192  }
  0xfd   : > { %2616 = vsyncadd (%p4007_p3), [#allocation7], 4294967104 }
  0xfe   : > { %2618 = dma.done.wait (%p4007_p3), [#allocation10], 1536  }
  0xff   : > { %2620 = vsyncadd (%p4007_p3), [#allocation10], 4294965760 }
 0x100   : > { %2622 = dma.done.wait (%p4007_p3), [#allocation13], 1536  }
 0x101   : > { %2624 = vsyncadd (%p4007_p3), [#allocation13], 4294965760 }
 0x102   : > { %2626 = dma.done.wait (%p4007_p3), [#allocation16], 192  }
 0x103   : > { %2628 = vsyncadd (%p4007_p3), [#allocation16], 4294967104  ;;  %s3977_s23 = sand.u32 1, %s2641_s14   ;;  %s1991_s11 = sshll.u32 %s2649_s16, 7 }
 0x104   : > { %s3039_s25 = sshll.u32 %s3977_s23, 3 }
 0x105   : > { %s442_s24 = scalar_lea.vmem [#allocation18], %s3039_s25 }
 0x106   : > { %s445_s22 = sshra.s32 %s1991_s11, 7  ;;  %s1992_s28 = sshll.u32 %s2653_s17, 2 }
 0x107   : > { %s448_s30 = sadd.s32 %s1992_s28, %s445_s22  ;;  %s2678_s0 = smov [#allocation2]  }
 0x108   : > { %s1993_s10 = sshll.u32 %s448_s30, 7  ;;  %s458_s2 = sshll.u32 %s2678_s0, 4  ;;  %s459_s2 = int_to_ptr.vmem [resolvable:$true] %s458_s2 }
 0x109   : > { %s4008_s27 = sld [smem:[#allocation41_spill]] }
 0x10f   : > { %s450_s13 = scalar_lea.hbm %s4008_s27, %s1993_s10  ;;  %s2527_s21 = scalar_lea.hbm %s4008_s27, 1024 }
 0x110   : > { %s2525_s15 = scalar_lea.hbm %s450_s13, 384  ;;  %p2528_p2 = scmp.lt.u32.totalorder %s450_s13, %s4008_s27 }
 0x111   : > { %p2526_p0 = scmp.ne.s32.totalorder %s450_s13, %s2525_s15  ;;  %p2529_p8 = scmp.lt.u32.totalorder %s2527_s21, %s2525_s15 }
 0x112   : > { %p2531_p12 = scmp.lt.u32.totalorder %s2525_s15, %s450_s13 }
 0x113   : > { %p2530_p10 = por %p2529_p8, %p2528_p2 }
 0x115   : > { %p2532_p4 = por %p2531_p12, %p2530_p10 }
 0x117   : > { %p2533_p5 = pnand %p2532_p4, %p2526_p0 }
 0x119   : > { %2536 = shalt.err (!%p2533_p5)  }
 0x11a   : > { %s2537_s11 = scalar_lea.vmem %s459_s2, 384  ;;  %p2542_p7 = scmp.lt.s32.totalorder %s459_s2, %s459_s2 }
 0x11b   : > { %p2538_p6 = scmp.ne.s32.totalorder %s459_s2, %s2537_s11  ;;  %p2543_p9 = scmp.lt.s32.totalorder %s2537_s11, %s2537_s11 }
 0x11d   : > { %p2544_p11 = por %p2543_p9, %p2542_p7 }
 0x11f   : > { %p2545_p13 = pnand %p2544_p11, %p2538_p6 }
 0x121   : > { %2548 = shalt.err (!%p2545_p13)  }
 0x122   : > { %461 = dma.hbm_to_vmem [thread:$0]  %s450_s13, 384, %s459_s2, [#allocation19] }
 0x123   : > { %2629 = dma.done.wait [#allocation19], 384 }
 0x124   : > { %2630 = vsyncadd [#allocation19], 4294966912  ;;  %v3052_v0 = vld [vmem:[#allocation2 + $0x10] sm:$0xff]  ;;  %v3054_v1 = vld [vmem:[#allocation2] sm:$0xff]  ;;  %s2679_s22 = smov 3   ;;  %s2680_s28 = smov 2   ;;  %v469_v5 = vlaneseq }
 0x125   : > { %498 = vrot.lane.b32.xlu1 %v3052_v0, %s2679_s22  ;;  %494 = vrot.lane.b32.xlu0 %v3054_v1, %s2679_s22  ;;  %v3058_v2 = vld [vmem:[#allocation2 + $0x8] sm:$0xff]  ;;  %s2681_s30 = smov 1   ;;  %s2682_s10 = smov 127  }
 0x126   : > { %s2683_s0 = smov 126   ;;  %s2684_s2 = smov 125   ;;  %v3085_v8 = vand.u32 127, %v469_v5 }
 0x127   : > { %s1994_s20 = sshll.u32 %s2649_s16, 3  ;;  %s2685_s12 = smov 48  }
 0x128   : > { %v3088_v11 = vadd.s32 128, %v3085_v8  ;;  %v3091_v12 = vadd.s32 256, %v3085_v8  ;;  %v3094_v15 = vand.u32 15, %v3085_v8  ;;  %vm500_vm0 = vcmp.lt.s32.totalorder %v3085_v8, 3  ;;  %s1995_s13 = sadd.s32 4294967288, %s1994_s20  ;;  %s2686_s15 = smov 32  }
 0x129   : > { %525 = vrot.lane.b32.xlu1 %v3054_v1, %s2680_s28  ;;  %496 = vrot.lane.b32.xlu0 %v3058_v2, %s2679_s22  ;;  %vm531_vm2 = vcmp.lt.s32.totalorder %v3085_v8, 2  ;;  %vm562_vm4 = vcmp.lt.s32.totalorder %v3085_v8, 1  ;;  %vm593_vm10 = vcmp.lt.s32.totalorder %v3085_v8, 127  ;;  %s2687_s18 = smov 16   ;;  %s2688_s26 = smov 112  }
 0x12a   : > { %v3097_v16 = vand.u32 15, %v3088_v11  ;;  %v3101_v17 = vand.u32 15, %v3091_v12  ;;  %vm504_vm1 = vcmp.ge.s32.totalorder %v3094_v15, 3  ;;  %vm535_vm3 = vcmp.ge.s32.totalorder %v3094_v15, 2  ;;  %s2689_s21 = smov 96   ;;  %s2690_s19 = smov 80  }
 0x12b   : > { %vm3968_vm6 = vcmp.ge.s32.totalorder %v3094_v15, 1  ;;  %vm597_vm14 = vcmp.lt.s32.totalorder %v3094_v15, 15  ;;  %s2694_s29 = smov 101   ;;  %s2695_s11 = smov 99  }
 0x12c   : > { %vm3967_vm5 = vcmp.ge.s32.totalorder %v3097_v16, 3  ;;  %vm506_vm7 = vcmp.ge.s32.totalorder %v3101_v17, 3  ;;  %vm536_vm8 = vcmp.ge.s32.totalorder %v3097_v16, 2  ;;  %vm3971_vm9 = vcmp.ge.s32.totalorder %v3101_v17, 2  ;;  %s2696_s22 = smov 100   ;;  %s2700_s23 = smov 123  }
 0x12d   : > { %529 = vrot.lane.b32.xlu1 %v3052_v0, %s2680_s28  ;;  %527 = vrot.lane.b32.xlu0 %v3058_v2, %s2680_s28  ;;  %vm3973_vm11 = vcmp.ge.s32.totalorder %v3097_v16, 1  ;;  %vm3975_vm12 = vcmp.ge.s32.totalorder %v3101_v17, 1  ;;  %vm3974_vm13 = vcmp.lt.s32.totalorder %v3101_v17, 15  ;;  %vm3972_vm15 = vcmp.lt.s32.totalorder %v3097_v16, 15  ;;  %s2697_s28 = smov 97  }
 0x131   : > { %558 = vrot.lane.b32.xlu1 %v3058_v2, %s2681_s30  ;;  %556 = vrot.lane.b32.xlu0 %v3054_v1, %s2681_s30 }
 0x135   : > { %587 = vrot.lane.b32.xlu1 %v3054_v1, %s2682_s10  ;;  %560 = vrot.lane.b32.xlu0 %v3052_v0, %s2681_s30  ;;  %s2698_s30 = smov 98  }
 0x139   : > { %591 = vrot.lane.b32.xlu1 %v3052_v0, %s2682_s10  ;;  %589 = vrot.lane.b32.xlu0 %v3058_v2, %s2682_s10 }
 0x13d   : > { %620 = vrot.lane.b32.xlu1 %v3058_v2, %s2683_s0  ;;  %618 = vrot.lane.b32.xlu0 %v3054_v1, %s2683_s0 }
 0x141   : > { %649 = vrot.lane.b32.xlu1 %v3054_v1, %s2684_s2  ;;  %622 = vrot.lane.b32.xlu0 %v3052_v0, %s2683_s0 }
 0x145   : > { %653 = vrot.lane.b32.xlu1 %v3052_v0, %s2684_s2  ;;  %651 = vrot.lane.b32.xlu0 %v3058_v2, %s2684_s2 }
 0x197   : > { %v499_v3 = vpop.permute.xlu1 %498  ;;  %v495_v4 = vpop.permute.xlu0 %494 }
 0x198   : > { %v3109_v20 = vsel %vm500_vm0, %v499_v3, %v495_v4 }
 0x199   : > { %v513_v26 = vsel %vm504_vm1, %v3109_v20, 0.0 }
 0x19a   : > { %v516_v33 = vadd.f32 %v513_v26, %v3054_v1 }
 0x19b   : > { %v526_v6 = vpop.permute.xlu1 %525  ;;  %v497_v7 = vpop.permute.xlu0 %496 }
 0x19c   : > { %v3114_v21 = vsel %vm500_vm0, %v495_v4, %v497_v7  ;;  %v3141_v28 = vsel %vm500_vm0, %v497_v7, %v499_v3  ;;  %vm624_vm0 = vcmp.lt.s32.totalorder %v3085_v8, 126 }
 0x19d   : > { %v514_v27 = vsel %vm3967_vm5, %v3114_v21, 0.0  ;;  %vm3969_vm5 = vcmp.lt.s32.totalorder %v3094_v15, 14  ;;  %v515_v39 = vsel %vm506_vm7, %v3141_v28, 0.0 }
 0x19e   : > { %v517_v34 = vadd.f32 %v514_v27, %v3058_v2  ;;  %v518_v49 = vadd.f32 %v515_v39, %v3052_v0  ;;  %v519_v39 = vsel %vm504_vm1, %v3109_v20, -1e+30 }
 0x19f   : > { %v530_v9 = vpop.permute.xlu1 %529  ;;  %v528_v10 = vpop.permute.xlu0 %527  ;;  %v522_v20 = vmax.f32 %v3054_v1, %v519_v39  ;;  %v478_v1 = vshra.s32 %v3091_v12, 4  ;;  %v1667_v12 = vld [vmem:[#allocation12 + $0x48] sm:$0xff] }
 0x1a0   : > { %v3123_v22 = vsel %vm531_vm2, %v530_v9, %v526_v6  ;;  %v3127_v23 = vsel %vm531_vm2, %v526_v6, %v528_v10  ;;  %v3164_v35 = vsel %vm531_vm2, %v528_v10, %v530_v9  ;;  %vm3970_vm2 = vcmp.lt.s32.totalorder %v3097_v16, 14 }
 0x1a1   : > { %v544_v31 = vsel %vm535_vm3, %v3123_v22, 0.0  ;;  %v545_v32 = vsel %vm536_vm8, %v3127_v23, 0.0  ;;  %v546_v47 = vsel %vm3971_vm9, %v3164_v35, 0.0 }
 0x1a2   : > { %v547_v43 = vadd.f32 %v544_v31, %v516_v33  ;;  %v548_v44 = vadd.f32 %v545_v32, %v517_v34  ;;  %v549_v59 = vadd.f32 %v546_v47, %v518_v49  ;;  %v476_v34 = vshra.s32 %v3085_v8, 4 }
 0x1a3   : > { %v559_v13 = vpop.permute.xlu1 %558  ;;  %v557_v14 = vpop.permute.xlu0 %556 }
 0x1a4   : > { %v3145_v29 = vsel %vm562_vm4, %v557_v14, %v559_v13 }
 0x1a5   : > { %v576_v40 = vsel %vm3973_vm11, %v3145_v29, 0.0 }
 0x1a6   : > { %v579_v50 = vadd.f32 %v576_v40, %v548_v44  ;;  %v551_v44 = vsel %vm536_vm8, %v3127_v23, -1e+30  ;;  %v582_v23 = vsel %vm3973_vm11, %v3145_v29, -1e+30 }
 0x1a7   : > { %v588_v18 = vpop.permute.xlu1 %587  ;;  %v561_v19 = vpop.permute.xlu0 %560 }
 0x1a8   : > { %v3149_v30 = vsel %vm562_vm4, %v561_v19, %v557_v14  ;;  %v3185_v45 = vsel %vm562_vm4, %v559_v13, %v561_v19  ;;  %vm655_vm4 = vcmp.lt.s32.totalorder %v3085_v8, 125 }
 0x1a9   : > { %v575_v41 = vsel %vm3968_vm6, %v3149_v30, 0.0  ;;  %vm3976_vm6 = vcmp.lt.s32.totalorder %v3101_v17, 14  ;;  %v577_v55 = vsel %vm3975_vm12, %v3185_v45, 0.0 }
 0x1aa   : > { %v578_v51 = vadd.f32 %v575_v41, %v547_v43  ;;  %v580_v3 = vadd.f32 %v577_v55, %v549_v59  ;;  %v550_v43 = vsel %vm535_vm3, %v3123_v22, -1e+30  ;;  %v521_v22 = vsel %vm506_vm7, %v3141_v28, -1e+30 }
 0x1ab   : > { %v592_v24 = vpop.permute.xlu1 %591  ;;  %v590_v25 = vpop.permute.xlu0 %589  ;;  %v553_v49 = vmax.f32 %v522_v20, %v550_v43 }
 0x1ac   : > { %v3168_v36 = vsel %vm593_vm10, %v588_v18, %v590_v25  ;;  %v3181_v42 = vsel %vm593_vm10, %v590_v25, %v592_v24  ;;  %v3208_v56 = vsel %vm593_vm10, %v592_v24, %v588_v18  ;;  %vm659_vm10 = vcmp.lt.s32.totalorder %v3094_v15, 13 }
 0x1ad   : > { %v606_v48 = vsel %vm597_vm14, %v3168_v36, 0.0  ;;  %v607_v52 = vsel %vm3972_vm15, %v3181_v42, 0.0  ;;  %v608_v4 = vsel %vm3974_vm13, %v3208_v56, 0.0  ;;  %v612_v28 = vsel %vm597_vm14, %v3168_v36, -1e+30 }
 0x1ae   : > { %v609_v60 = vadd.f32 %v606_v48, %v578_v51  ;;  %v610_v62 = vadd.f32 %v607_v52, %v579_v50  ;;  %v611_v25 = vadd.f32 %v608_v4, %v580_v3  ;;  %v613_v29 = vsel %vm3972_vm15, %v3181_v42, -1e+30 }
 0x1af   : > { %v621_v37 = vpop.permute.xlu1 %620  ;;  %v619_v38 = vpop.permute.xlu0 %618  ;;  %vm4012_vm15 = vcmp.lt.s32.totalorder %v3097_v16, 14 }
 0x1b0   : > { %v3189_v46 = vsel %vm624_vm0, %v619_v38, %v621_v37 }
 0x1b1   : > { %v637_v57 = vsel %vm3969_vm5, %v3189_v46, 0.0  ;;  %vm3985_vm5 = vcmp.lt.s32.totalorder %v3097_v16, 13 }
 0x1b2   : > { %v640_v5 = vadd.f32 %v637_v57, %v609_v60 }
 0x1b3   : > { %v650_v53 = vpop.permute.xlu1 %649  ;;  %v623_v54 = vpop.permute.xlu0 %622 }
 0x1b4   : > { %v3215_v58 = vsel %vm624_vm0, %v621_v37, %v623_v54  ;;  %v3223_v63 = vsel %vm624_vm0, %v623_v54, %v619_v38  ;;  %v481_v37 = vstv %s1995_s13  ;;  %v477_v38 = vshra.s32 %v3088_v11, 4  ;;  %s2699_s13 = smov 124  }
 0x1b5   : > { %v638_v61 = vsel %vm3970_vm2, %v3215_v58, 0.0  ;;  %vm3982_vm2 = vcmp.lt.s32.totalorder %v3101_v17, 13  ;;  %v639_v18 = vsel %vm3976_vm6, %v3223_v63, 0.0  ;;  %vm4009_vm0 = vcmp.ge.s32.totalorder %v3097_v16, 3 }
 0x1b6   : > { %v641_v9 = vadd.f32 %v638_v61, %v610_v62  ;;  %v642_v32 = vadd.f32 %v639_v18, %v611_v25  ;;  %v520_v40 = vsel %vm4009_vm0, %v3114_v21, -1e+30  ;;  %v482_v41 = vadd.s32 %v481_v37, %v476_v34 }
 0x1b7   : > { %v654_v6 = vpop.permute.xlu1 %653  ;;  %v652_v7 = vpop.permute.xlu0 %651  ;;  %v523_v21 = vmax.f32 %v3058_v2, %v520_v40  ;;  %v483_v47 = vadd.s32 %v481_v37, %v477_v38  ;;  %v552_v2 = vsel %vm3971_vm9, %v3164_v35, -1e+30  ;;  %v583_v35 = vsel %vm3975_vm12, %v3185_v45, -1e+30 }
 0x1b8   : > { %v3231_v10 = vsel %vm655_vm4, %v654_v6, %v650_v53  ;;  %v656_v13 = vsel %vm655_vm4, %v652_v7, %v654_v6  ;;  %v657_v14 = vsel %vm655_vm4, %v650_v53, %v652_v7  ;;  %vm4010_vm4 = vcmp.ge.s32.totalorder %v3094_v15, 1 }
 0x1b9   : > { %v668_v19 = vsel %vm659_vm10, %v657_v14, 0.0  ;;  %v669_v24 = vsel %vm3985_vm5, %v656_v13, 0.0  ;;  %v670_v31 = vsel %vm3982_vm2, %v3231_v10, 0.0  ;;  %v581_v48 = vsel %vm4010_vm4, %v3149_v30, -1e+30 }
 0x1ba   : > { %v3241_v26 = vadd.f32 %v668_v19, %v640_v5  ;;  %v3243_v27 = vadd.f32 %v669_v24, %v641_v9  ;;  %v3254_v33 = vadd.f32 %v670_v31, %v642_v32  ;;  %v554_v50 = vmax.f32 %v523_v21, %v551_v44 }
 0x1bb   : > { %vm485_vm0 = vcmp.ge.s32.totalorder %v482_v41, 0  ;;  %v524_v30 = vmax.f32 %v3052_v0, %v521_v22  ;;  %v584_v52 = vmax.f32 %v553_v49, %v581_v48  ;;  %vm486_vm4 = vcmp.ge.s32.totalorder %v483_v47, 0 }
 0x1bc   : > { %689 = vrot.lane.b32.xlu0 %v3241_v26, %s2685_s12  ;;  %691 = vrot.lane.b32.xlu1 %v3243_v27, %s2685_s12  ;;  %v585_v51 = vmax.f32 %v554_v50, %v582_v23  ;;  %vm4011_vm9 = vcmp.lt.s32.totalorder %v3094_v15, 14  ;;  %v644_v42 = vsel %vm4012_vm15, %v3215_v58, -1e+30  ;;  %vm488_vm11 = vcmp.lt.s32.totalorder %v482_v41, 16 }
 0x1bd   : > { %v643_v36 = vsel %vm4011_vm9, %v3189_v46, -1e+30  ;;  %v555_v53 = vmax.f32 %v524_v30, %v552_v2  ;;  %v615_v54 = vmax.f32 %v584_v52, %v612_v28  ;;  %v614_v0 = vsel %vm3974_vm13, %v3208_v56, -1e+30  ;;  %vm491_vm15 = vmand %vm485_vm0, %vm488_vm11 }
 0x1be   : > { %v616_v55 = vmax.f32 %v585_v51, %v613_v29  ;;  %v484_v57 = vadd.s32 %v481_v37, %v478_v1  ;;  %v674_v45 = vsel %vm659_vm10, %v657_v14, -1e+30  ;;  %v675_v46 = vsel %vm3985_vm5, %v656_v13, -1e+30 }
 0x1bf   : > { %v586_v58 = vmax.f32 %v555_v53, %v583_v35  ;;  %v646_v59 = vmax.f32 %v615_v54, %v643_v36  ;;  %vm489_vm9 = vcmp.lt.s32.totalorder %v483_v47, 16  ;;  %v645_v56 = vsel %vm3976_vm6, %v3223_v63, -1e+30 }
 0x1c0   : > { %693 = vrot.lane.b32.xlu0 %v3254_v33, %s2685_s12  ;;  %714 = vrot.lane.b32.xlu1 %v3241_v26, %s2686_s15  ;;  %v647_v60 = vmax.f32 %v616_v55, %v644_v42  ;;  %v676_v4 = vsel %vm3982_vm2, %v3231_v10, -1e+30  ;;  %vm492_vm13 = vmand %vm486_vm4, %vm489_vm9  ;;  %vm487_vm12 = vcmp.ge.s32.totalorder %v484_v57, 0  ;;  %vm490_vm6 = vcmp.lt.s32.totalorder %v484_v57, 16 }
 0x1c1   : > { %v617_v61 = vmax.f32 %v586_v58, %v614_v0  ;;  %v677_v62 = vmax.f32 %v646_v59, %v674_v45  ;;  %vm493_vm11 = vmand %vm487_vm12, %vm490_vm6  ;;  %vm695_vm6 = vcmp.lt.s32.totalorder %v3085_v8, 48  ;;  %vm720_vm12 = vcmp.lt.s32.totalorder %v3085_v8, 32 }
 0x1c2   : > { %v678_v3 = vmax.f32 %v647_v60, %v675_v46  ;;  %vm770_vm0 = vcmp.lt.s32.totalorder %v3085_v8, 112  ;;  %vm795_vm4 = vcmp.lt.s32.totalorder %v3085_v8, 96  ;;  %vm820_vm9 = vcmp.lt.s32.totalorder %v3085_v8, 80 }
 0x1c3   : > { %v648_v5 = vmax.f32 %v617_v61, %v645_v56  ;;  %v3342_v6 = vsel %vm491_vm15, %v677_v62, -1e+30  ;;  %vm2692_vm15 = vmmov 0   ;;  %vm1159_vm5 = vcmp.ge.s32.totalorder %v3097_v16, 4 }
 0x1c4   : > { %716 = vrot.lane.b32.xlu0 %v3243_v27, %s2686_s15  ;;  %718 = vrot.lane.b32.xlu1 %v3254_v33, %s2686_s15  ;;  %v3344_v7 = vsel %vm492_vm13, %v678_v3, -1e+30  ;;  %vm745_vm13 = vcmp.lt.s32.totalorder %v3085_v8, 16 }
 0x1c5   : > { %v679_v63 = vmax.f32 %v648_v5, %v676_v4  ;;  %v2221_v9 = vpack.i.bf16 %v3344_v7, %v3342_v6 }
 0x1c7   : > { %v3352_v10 = vsel %vm493_vm11, %v679_v63, -1e+30  ;;  %vm3980_vm11 = vcmask 654336  }
 0x1c8   : > { %739 = vrot.lane.b32.xlu0 %v3241_v26, %s2687_s18  ;;  %741 = vrot.lane.b32.xlu1 %v3243_v27, %s2687_s18 }
 0x1cc   : > { %743 = vrot.lane.b32.xlu0 %v3254_v33, %s2687_s18  ;;  %764 = vrot.lane.b32.xlu1 %v3241_v26, %s2688_s26 }
 0x1d0   : > { %766 = vrot.lane.b32.xlu0 %v3243_v27, %s2688_s26  ;;  %768 = vrot.lane.b32.xlu1 %v3254_v33, %s2688_s26 }
 0x1d4   : > { %789 = vrot.lane.b32.xlu0 %v3241_v26, %s2689_s21  ;;  %791 = vrot.lane.b32.xlu1 %v3243_v27, %s2689_s21 }
 0x1d8   : > { %2222 = vrot.lane.b32.xlu0 %v2221_v9, %s2685_s12  ;;  %706 = vrot.lane.b32.xlu1 %v3352_v10, %s2685_s12 }
 0x1dc   : > { %2227 = vrot.lane.b32.xlu0 %v2221_v9, %s2686_s15  ;;  %731 = vrot.lane.b32.xlu1 %v3352_v10, %s2686_s15 }
 0x1e0   : > { %2232 = vrot.lane.b32.xlu0 %v2221_v9, %s2687_s18  ;;  %756 = vrot.lane.b32.xlu1 %v3352_v10, %s2687_s18 }
 0x1e4   : > { %2237 = vrot.lane.b32.xlu0 %v2221_v9, %s2688_s26  ;;  %781 = vrot.lane.b32.xlu1 %v3352_v10, %s2688_s26 }
 0x1e8   : > { %806 = vrot.lane.b32.xlu0 %v3352_v10, %s2689_s21  ;;  %2242 = vrot.lane.b32.xlu1 %v2221_v9, %s2689_s21 }
 0x1ec   : > { %2247 = vrot.lane.b32.xlu0 %v2221_v9, %s2690_s19  ;;  %831 = vrot.lane.b32.xlu1 %v3352_v10, %s2690_s19 }
 0x1f0   : > { %793 = vrot.lane.b32.xlu0 %v3254_v33, %s2689_s21  ;;  %814 = vrot.lane.b32.xlu1 %v3241_v26, %s2690_s19 }
 0x1f4   : > { %816 = vrot.lane.b32.xlu0 %v3243_v27, %s2690_s19  ;;  %818 = vrot.lane.b32.xlu1 %v3254_v33, %s2690_s19 }
 0x22e   : > { %v690_v13 = vpop.permute.xlu0 %689  ;;  %v692_v14 = vpop.permute.xlu1 %691 }
 0x22f   : > { %v697_v23 = vsel %vm695_vm6, %v690_v13, %v692_v14 }
 0x230   : > { %v700_v29 = vadd.f32 %v697_v23, %v3243_v27 }
 0x232   : > { %v694_v18 = vpop.permute.xlu0 %693  ;;  %v715_v19 = vpop.permute.xlu1 %714 }
 0x233   : > { %v696_v48 = vsel %vm695_vm6, %v692_v14, %v694_v18  ;;  %v698_v49 = vsel %vm695_vm6, %v694_v18, %v690_v13 }
 0x234   : > { %v699_v53 = vadd.f32 %v698_v49, %v3241_v26  ;;  %v701_v54 = vadd.f32 %v696_v48, %v3254_v33 }
 0x236   : > { %v717_v24 = vpop.permute.xlu0 %716  ;;  %v719_v25 = vpop.permute.xlu1 %718 }
 0x237   : > { %v722_v50 = vsel %vm720_vm12, %v715_v19, %v717_v24  ;;  %v721_v52 = vsel %vm720_vm12, %v717_v24, %v719_v25  ;;  %v723_v35 = vsel %vm720_vm12, %v719_v25, %v715_v19 }
 0x238   : > { %v725_v55 = vadd.f32 %v722_v50, %v700_v29  ;;  %v724_v58 = vadd.f32 %v723_v35, %v699_v53  ;;  %v726_v59 = vadd.f32 %v721_v52, %v701_v54  ;;  %v2691_v29 = vmov 0.0  }
 0x239   : > { %2015 = vmatprep.subr.bf16.mxu1 %v2691_v29  ;;  %2017 = vmatprep.mubr.msk.bf16.mxu1 %vm2692_vm15, %v2691_v29 }
 0x23a   : > { %v740_v31 = vpop.permute.xlu0 %739  ;;  %v742_v32 = vpop.permute.xlu1 %741 }
 0x23b   : > { %v747_v27 = vsel %vm745_vm13, %v740_v31, %v742_v32 }
 0x23c   : > { %v750_v5 = vadd.f32 %v747_v27, %v725_v55 }
 0x23e   : > { %v744_v37 = vpop.permute.xlu0 %743  ;;  %v3380_v39 = vpop.permute.xlu1 %764 }
 0x23f   : > { %v748_v26 = vsel %vm745_vm13, %v744_v37, %v740_v31  ;;  %v746_v63 = vsel %vm745_vm13, %v742_v32, %v744_v37 }
 0x240   : > { %v749_v14 = vadd.f32 %v748_v26, %v724_v58  ;;  %v751_v50 = vadd.f32 %v746_v63, %v726_v59 }
 0x242   : > { %v3382_v40 = vpop.permute.xlu0 %766  ;;  %v3384_v41 = vpop.permute.xlu1 %768 }
 0x243   : > { %v771_v27 = vsel %vm770_vm0, %v3382_v40, %v3384_v41 }
 0x246   : > { %v3386_v43 = vpop.permute.xlu0 %789  ;;  %v3388_v44 = vpop.permute.xlu1 %791 }
 0x24a   : > { %v2223_v20 = vpop.permute.xlu0 %2222  ;;  %v707_v21 = vpop.permute.xlu1 %706 }
 0x24b   : > { %v2225_v2 = vunpack.i.h.bf16 %v2223_v20  ;;  %v2224_v28 = vunpack.i.l.bf16 %v2223_v20 }
 0x24d   : > { %v709_v0 = vsel %vm695_vm6, %v2224_v28, %v2225_v2  ;;  %v710_v57 = vsel %vm695_vm6, %v707_v21, %v2224_v28  ;;  %v708_v33 = vsel %vm695_vm6, %v2225_v2, %v707_v21  ;;  %vm3979_vm6 = vcmask 1043456  }
 0x24e   : > { %v2228_v47 = vpop.permute.xlu0 %2227  ;;  %v732_v22 = vpop.permute.xlu1 %731  ;;  %v712_v9 = vmax.f32 %v3344_v7, %v709_v0  ;;  %v711_v13 = vmax.f32 %v3342_v6, %v710_v57  ;;  %v713_v25 = vmax.f32 %v3352_v10, %v708_v33 }
 0x24f   : > { %v2230_v36 = vunpack.i.h.bf16 %v2228_v47  ;;  %v2229_v42 = vunpack.i.l.bf16 %v2228_v47 }
 0x251   : > { %v734_v61 = vsel %vm720_vm12, %v2229_v42, %v2230_v36  ;;  %v735_v62 = vsel %vm720_vm12, %v732_v22, %v2229_v42  ;;  %v733_v18 = vsel %vm720_vm12, %v2230_v36, %v732_v22  ;;  %vm3978_vm12 = vcmask 64512  }
 0x252   : > { %v2233_v30 = vpop.permute.xlu0 %2232  ;;  %v757_v51 = vpop.permute.xlu1 %756  ;;  %v736_v31 = vmax.f32 %v711_v13, %v735_v62  ;;  %v737_v37 = vmax.f32 %v712_v9, %v734_v61  ;;  %v738_v23 = vmax.f32 %v713_v25, %v733_v18 }
 0x253   : > { %v2235_v45 = vunpack.i.h.bf16 %v2233_v30  ;;  %v2234_v46 = vunpack.i.l.bf16 %v2233_v30  ;;  %v772_v30 = vsel %vm770_vm0, %v3380_v39, %v3382_v40 }
 0x254   : > { %v774_v62 = vadd.f32 %v772_v30, %v749_v14 }
 0x255   : > { %v760_v19 = vsel %vm745_vm13, %v757_v51, %v2234_v46  ;;  %v759_v24 = vsel %vm745_vm13, %v2234_v46, %v2235_v45  ;;  %v758_v32 = vsel %vm745_vm13, %v2235_v45, %v757_v51  ;;  %v773_v46 = vsel %vm770_vm0, %v3384_v41, %v3380_v39 }
 0x256   : > { %v2238_v60 = vpop.permute.xlu0 %2237  ;;  %v782_v56 = vpop.permute.xlu1 %781  ;;  %v761_v48 = vmax.f32 %v736_v31, %v760_v19  ;;  %v762_v49 = vmax.f32 %v737_v37, %v759_v24  ;;  %v763_v51 = vmax.f32 %v738_v23, %v758_v32  ;;  %v797_v39 = vsel %vm795_vm4, %v3386_v43, %v3388_v44  ;;  %v1058_v23 = vld [vmem:[#allocation8] sm:$0xff] }
 0x257   : > { %v2240_v3 = vunpack.i.h.bf16 %v2238_v60  ;;  %v2239_v4 = vunpack.i.l.bf16 %v2238_v60  ;;  %v776_v18 = vadd.f32 %v773_v46, %v751_v50  ;;  %v799_v19 = vadd.f32 %v797_v39, %v774_v62  ;;  %v1267_v50 = vld [vmem:[#allocation9 + $0x20] sm:$0xff]  ;;  %v839_v46 = vld [vmem:[#allocation3] sm:$0xf] }
 0x258   : > { %vm3981_vm13 = vcmask 1047808  }
 0x259   : > { %v784_v6 = vsel %vm770_vm0, %v2239_v4, %v2240_v3  ;;  %v783_v21 = vsel %vm770_vm0, %v2240_v3, %v782_v56  ;;  %v785_v10 = vsel %vm770_vm0, %v782_v56, %v2239_v4  ;;  %v2693_v3 = vmov 0  }
 0x25a   : > { %v807_v7 = vpop.permute.xlu0 %806  ;;  %v2243_v20 = vpop.permute.xlu1 %2242  ;;  %v787_v52 = vmax.f32 %v762_v49, %v783_v21  ;;  %v786_v42 = vmax.f32 %v761_v48, %v784_v6  ;;  %v788_v0 = vmax.f32 %v763_v51, %v785_v10  ;;  %905 = vmatprep.mubr.bf16.mxu0 %v2693_v3  ;;  %2251 = vset.pattern.permute.xlu0 %v2693_v3  ;;  %v1146_v48 = vld [vmem:[#allocation9] sm:$0xff]  ;;  %v1211_v49 = vld [vmem:[#allocation9 + $0x10] sm:$0xff]  ;;  %v1325_v10 = vld [vmem:[#allocation9 + $0x38] sm:$0xff]  ;;  %vm1173_vm0 = vcmask 818176  }
 0x25b   : > { %v2245_v47 = vunpack.i.h.bf16 %v2243_v20  ;;  %v2244_v22 = vunpack.i.l.bf16 %v2243_v20  ;;  %v775_v4 = vadd.f32 %v771_v27, %v750_v5  ;;  %2252 = vset.pattern.permute.xlu1 %v2693_v3 }
 0x25d   : > { %v808_v2 = vsel %vm795_vm4, %v2245_v47, %v807_v7  ;;  %v809_v28 = vsel %vm795_vm4, %v2244_v22, %v2245_v47  ;;  %v810_v55 = vsel %vm795_vm4, %v807_v7, %v2244_v22 }
 0x25e   : > { %v2248_v35 = vpop.permute.xlu0 %2247  ;;  %v832_v36 = vpop.permute.xlu1 %831  ;;  %v812_v57 = vmax.f32 %v787_v52, %v808_v2  ;;  %v811_v45 = vmax.f32 %v786_v42, %v809_v28  ;;  %v813_v61 = vmax.f32 %v788_v0, %v810_v55 }
 0x25f   : > { %v2250_v53 = vunpack.i.h.bf16 %v2248_v35  ;;  %v2249_v54 = vunpack.i.l.bf16 %v2248_v35 }
 0x261   : > { %v833_v58 = vsel %vm820_vm9, %v2250_v53, %v832_v36  ;;  %v835_v59 = vsel %vm820_vm9, %v832_v36, %v2249_v54  ;;  %v834_v40 = vsel %vm820_vm9, %v2249_v54, %v2250_v53  ;;  %v843_v53 = vld [vmem:[#allocation6] sm:$0xf] }
 0x262   : > { %v794_v26 = vpop.permute.xlu0 %793  ;;  %v815_v33 = vpop.permute.xlu1 %814  ;;  %v837_v60 = vmax.f32 %v812_v57, %v833_v58  ;;  %v836_v56 = vmax.f32 %v811_v45, %v834_v40  ;;  %v838_v13 = vmax.f32 %v813_v61, %v835_v59 }
 0x263   : > { %v796_v41 = vsel %vm795_vm4, %v3388_v44, %v794_v26  ;;  %v798_v14 = vsel %vm795_vm4, %v794_v26, %v3386_v43  ;;  %vm1137_vm4 = vcmask 826368  }
 0x264   : > { %v845_v63 = vpack.c.bf16 %v837_v60, %v837_v60  ;;  %v844_v9 = vpack.c.bf16 %v836_v56, %v836_v56  ;;  %v800_v24 = vadd.f32 %v796_v41, %v775_v4  ;;  %v801_v37 = vadd.f32 %v798_v14, %v776_v18 }
 0x265   : > { %v846_v7 = vpack.c.bf16 %v838_v13, %v838_v13 }
 0x266   : > { %v817_v25 = vpop.permute.xlu0 %816  ;;  %v819_v44 = vpop.permute.xlu1 %818  ;;  %852 = vrot.lane.b32.xlu1 %v845_v63, %s2690_s19  ;;  %850 = vrot.lane.b32.xlu0 %v844_v9, %s2690_s19 }
 0x267   : > { %v822_v5 = vsel %vm820_vm9, %v815_v33, %v817_v25  ;;  %v821_v31 = vsel %vm820_vm9, %v817_v25, %v819_v44  ;;  %v823_v32 = vsel %vm820_vm9, %v819_v44, %v815_v33  ;;  %vm1119_vm9 = vcmp.ge.s32.totalorder %v3094_v15, 5 }
 0x268   : > { %v824_v43 = vadd.f32 %v822_v5, %v799_v19  ;;  %v825_v20 = vadd.f32 %v821_v31, %v800_v24  ;;  %v826_v21 = vadd.f32 %v823_v32, %v801_v37 }
 0x26a   : > { %v840_v6 = vpack.c.bf16 %v824_v43, %v824_v43  ;;  %854 = vrot.lane.b32.xlu0 %v846_v7, %s2690_s19  ;;  %v841_v47 = vpack.c.bf16 %v825_v20, %v825_v20  ;;  %v842_v22 = vpack.c.bf16 %v826_v21, %v826_v21 }
 0x26c   : > { %957 = vrot.lane.b32.xlu1 %v840_v6, %s2690_s19 }
 0x26e   : > { %959 = vrot.lane.b32.xlu0 %v841_v47, %s2690_s19 }
 0x270   : > { %961 = vrot.lane.b32.xlu1 %v842_v22, %s2690_s19  ;;  %v1390_v22 = vld [vmem:[#allocation9 + $0x48] sm:$0xff] }
 0x272   : > { %1061 = vperm.xlu0 %2251, %v1058_v23  }
 0x276   : > { %1149 = vperm.xlu0 %2251, %v1146_v48   ;;  %v1100_v48 = vld [vmem:[#allocation9 + $0x28] sm:$0xff] }
 0x27a   : > { %1214 = vperm.xlu0 %2251, %v1211_v49   ;;  %v1183_v49 = vld [vmem:[#allocation9 + $0x8] sm:$0xff] }
 0x27e   : > { %1270 = vperm.xlu0 %2251, %v1267_v50   ;;  %v1239_v50 = vld [vmem:[#allocation9 + $0x18] sm:$0xff] }
 0x282   : > { %1328 = vperm.xlu0 %2251, %v1325_v10   ;;  %v1297_v10 = vld [vmem:[#allocation9 + $0x30] sm:$0xff] }
 0x2d8   : > { %v853_v2 = vpop.permute.xlu1 %852  ;;  %v851_v28 = vpop.permute.xlu0 %850 }
 0x2d9   : > { %v857_v30 = vsel %vm3980_vm11, %v851_v28, %v853_v2  ;;  %v1427_v28 = vld [vmem:[#allocation9 + $0x50] sm:$0xff] }
 0x2da   : > { %v865_v42 = vsel %vm3979_vm6, %v857_v30, 0 }
 0x2dc   : > { %v855_v51 = vpop.permute.xlu0 %854 }
 0x2dd   : > { %v858_v52 = vsel %vm3980_vm11, %v853_v2, %v855_v51  ;;  %v871_v35 = vsel %vm3979_vm6, %v855_v51, 0  ;;  %v1353_v2 = vld [vmem:[#allocation9 + $0x40] sm:$0xff] }
 0x2de   : > { %v958_v36 = vpop.permute.xlu1 %957  ;;  %1996 = vmatprep.subr.msk.bf16.mxu0 %vm3979_vm6, %v858_v52  ;;  %2016 = vmatpush3.bf16.msra.mxu1 %v871_v35 }
 0x2df   : > { %874 = vmatpush1.bf16.msra.mxu0 %v865_v42  ;;  %2021 = vmatprep.subr.bf16.mxu1 %v2691_v29 }
 0x2e0   : > { %v960_v54 = vpop.permute.xlu0 %959 }
 0x2e1   : > { %v963_v55 = vsel %vm3980_vm11, %v958_v36, %v960_v54  ;;  %2018 = vmatmul.mubr.msk.bf16.vlgmr.msra.gmra.mrb[0].mxu1 %vm3978_vm12, %v843_v53 }
 0x2e2   : > { %v962_v27 = vpop.permute.xlu1 %961  ;;  %1997 = vmatmul.mubr.msk.bf16.vlgmr.msra.gmra.mrb[0].mxu0 %vm3978_vm12, %v843_v53  ;;  %2023 = vmatprep.mubr.msk.bf16.mxu1 %vm2692_vm15, %v2691_v29  ;;  %v969_v45 = vsel %vm3979_vm6, %v963_v55, 0 }
 0x2e3   : > { %v964_v0 = vsel %vm3980_vm11, %v960_v54, %v962_v27  ;;  %v975_v57 = vsel %vm3979_vm6, %v962_v27, 0  ;;  %1009 = vmatprep.mubr.bf16.mxu0 %v2693_v3  ;;  %vm1315_vm11 = vcmask 1031168  }
 0x2e4   : > { %1999 = vmatprep.subr.msk.bf16.mxu0 %vm3979_vm6, %v964_v0  ;;  %2022 = vmatpush3.bf16.msra.mxu1 %v975_v57  ;;  %vm1229_vm6 = vcmask 801792  }
 0x2e5   : > { %978 = vmatpush1.bf16.msra.mxu0 %v969_v45 }
 0x2e6   : > { %2027 = vmatprep.subr.bf16.mxu0 %v2691_v29 }
 0x2e9   : > { %2024 = vmatmul.mubr.msk.bf16.vlgmr.msra.gmra.mrb[4].mxu1 %vm3978_vm12, %v839_v46 }
 0x2ea   : > { %2000 = vmatmul.mubr.msk.bf16.vlgmr.msra.gmra.mrb[4].mxu0 %vm3978_vm12, %v839_v46  ;;  %v1439_v46 = vld [vmem:[#allocation11] sm:$0xff]  ;;  %vm1201_vm12 = vcmask 809984  }
 0x2eb   : > { %2029 = vmatprep.mubr.msk.bf16.mxu0 %vm2692_vm15, %v2691_v29  ;;  %vm1158_vm15 = vcmp.ge.s32.totalorder %v3094_v15, 4 }
 0x2f1   : > { %v1062_v62 = vpop.permute.xlu0 %1061 }
 0x3b4   : > { %v948_v58 = vpop.f32.mrb[0].mxu1 }
 0x3b5   : > { %v907_v59 = vpop.f32.mrb[0].mxu0  ;;  %v2019_v40 = vpop.f32.mrb[1].mxu1 }
 0x3b6   : > { %v909_v26 = vpop.f32.mrb[1].mxu0  ;;  %v951_v33 = vpop.f32.mrb[2].mxu1 }
 0x3b7   : > { %v911_v60 = vpop.f32.mrb[2].mxu0  ;;  %v2020_v56 = vpop.f32.mrb[3].mxu1 }
 0x3b8   : > { %v912_v61 = vpop.f32.mrb[3].mxu0 }
 0x3bc   : > { %v1052_v39 = vpop.f32.mrb[4].mxu1 }
 0x3bd   : > { %v1053_v41 = vadd.f32 %v1052_v39, %v948_v58  ;;  %v1011_v3 = vpop.f32.mrb[4].mxu0  ;;  %v2025_v4 = vpop.f32.mrb[5].mxu1 }
 0x3be   : > { %v1012_v63 = vadd.f32 %v1011_v3, %v907_v59  ;;  %v1013_v9 = vpop.f32.mrb[5].mxu0  ;;  %v1055_v13 = vpop.f32.mrb[6].mxu1 }
 0x3bf   : > { %v1014_v14 = vadd.f32 %v1013_v9, %v909_v26  ;;  %v1015_v18 = vpop.f32.mrb[6].mxu0  ;;  %v2026_v19 = vpop.f32.mrb[7].mxu1  ;;  %v1066_v30 = vadd.f32 %v1062_v62, %v1053_v41 }
 0x3c0   : > { %v1064_v29 = vadd.f32 %v1062_v62, %v1012_v63  ;;  %v1016_v24 = vpop.f32.mrb[7].mxu0  ;;  %v3571_v58 = vpop.permute.xlu0 %1149 }
 0x3c1   : > { %v1065_v25 = vadd.f32 %v1062_v62, %v1014_v14  ;;  %v1069_v51 = vsub.f32 0.0, %v1066_v30 }
 0x3c2   : > { %v1067_v44 = vsub.f32 0.0, %v1064_v29 }
 0x3c3   : > { %v1068_v5 = vsub.f32 0.0, %v1065_v25  ;;  %v1074_v52 = vmul.f32 1.442695, %v1069_v51 }
 0x3c4   : > { %v1070_v31 = vmul.f32 1.442695, %v1067_v44  ;;  %v3575_v40 = vpop.permute.xlu0 %1214 }
 0x3c5   : > { %v1072_v32 = vmul.f32 1.442695, %v1068_v5 }
 0x3c6   : > { %2253 = vpow2.f32 %v1070_v31 }
 0x3c7   : > { %2255 = vpow2.f32 %v1072_v32 }
 0x3c8   : > { %v3579_v33 = vpop.permute.xlu0 %1270 }
 0x3cc   : > { %v3583_v56 = vpop.permute.xlu0 %1328 }
 0x3d0   : > { %v2254_v37 = vpop.eup %2253 }
 0x3d1   : > { %v2256_v43 = vpop.eup %2255  ;;  %v1076_v7 = vadd.f32 1.0, %v2254_v37 }
 0x3d2   : > { %v1077_v20 = vadd.f32 1.0, %v2256_v43 }
 0x3d3   : > { %2257 = vrcp.f32 %v1076_v7 }
 0x3d4   : > { %2259 = vrcp.f32 %v1077_v20 }
 0x3d5   : > { %2261 = vpow2.f32 %v1074_v52 }
 0x3dd   : > { %v2258_v6 = vpop.eup %2257 }
 0x3de   : > { %v3517_v21 = vmul.f32 %v2258_v6, %v1064_v29  ;;  %v2260_v47 = vpop.eup %2259 }
 0x3df   : > { %v3523_v23 = vmul.f32 %v2260_v47, %v1065_v25  ;;  %v2262_v35 = vpop.eup %2261 }
 0x3e0   : > { %1281 = vrot.lane.b32.xlu0 %v3517_v21, %s2682_s10  ;;  %1110 = vrot.lane.b32.xlu1 %v3517_v21, %s2686_s15  ;;  %v1078_v36 = vadd.f32 1.0, %v2262_v35  ;;  %v1524_v35 = vld [vmem:[#allocation12 + $0x10] sm:$0xff] }
 0x3e2   : > { %2263 = vrcp.f32 %v1078_v36 }
 0x3e4   : > { %1393 = vperm.xlu0 %2251, %v1390_v22   ;;  %1113 = vrot.lane.b32.xlu1 %v3523_v23, %s2686_s15 }
 0x3e8   : > { %1337 = vrot.lane.b32.xlu0 %v3517_v21, %s2684_s2  ;;  %1103 = vperm.xlu1 %2252, %v1100_v48  }
 0x3ec   : > { %1311 = vrot.lane.b32.xlu0 %v3523_v23, %s2683_s0  ;;  %1186 = vperm.xlu1 %2252, %v1183_v49   ;;  %v2264_v42 = vpop.eup %2263 }
 0x3ed   : > { %v1084_v53 = vmul.f32 %v2264_v42, %v1066_v30 }
 0x3f0   : > { %1242 = vperm.xlu1 %2252, %v1239_v50  }
 0x3f4   : > { %1300 = vperm.xlu1 %2252, %v1297_v10  }
 0x3f8   : > { %1356 = vperm.xlu1 %2252, %v1353_v2  }
 0x3fc   : > { %1309 = vrot.lane.b32.xlu1 %v3517_v21, %s2683_s0 }
 0x400   : > { %1430 = vperm.xlu1 %2252, %v1427_v28  }
 0x404   : > { %1283 = vrot.lane.b32.xlu1 %v3523_v23, %s2682_s10 }
 0x452   : > { %v1111_v54 = vpop.permute.xlu1 %1110  ;;  %v1282_v62 = vpop.permute.xlu0 %1281 }
 0x453   : > { %v3536_v55 = vsel %vm3981_vm13, %v1111_v54, %v1084_v53 }
 0x454   : > { %1131 = vrot.lane.b32.xlu1 %v3536_v55, %s2694_s29  ;;  %1115 = vrot.lane.b32.xlu0 %v3536_v55, %s2686_s15 }
 0x456   : > { %v1114_v27 = vpop.permute.xlu1 %1113 }
 0x457   : > { %v1117_v0 = vsel %vm3981_vm13, %v1114_v27, %v1111_v54  ;;  %v1564_v54 = vld [vmem:[#allocation12 + $0x20] sm:$0xff] }
 0x458   : > { %1195 = vrot.lane.b32.xlu1 %v3536_v55, %s2695_s11  ;;  %1167 = vrot.lane.b32.xlu0 %v3536_v55, %s2696_s22 }
 0x45c   : > { %1251 = vrot.lane.b32.xlu1 %v3536_v55, %s2697_s28  ;;  %1223 = vrot.lane.b32.xlu0 %v3536_v55, %s2698_s30 }
 0x460   : > { %1169 = vrot.lane.b32.xlu1 %v1117_v0, %s2696_s22  ;;  %1133 = vrot.lane.b32.xlu0 %v1117_v0, %s2694_s29 }
 0x463   : > { %v3587_v39 = vpop.permute.xlu0 %1393 }
 0x464   : > { %1225 = vrot.lane.b32.xlu1 %v1117_v0, %s2698_s30  ;;  %1197 = vrot.lane.b32.xlu0 %v1117_v0, %s2695_s11 }
 0x467   : > { %v3555_v57 = vpop.permute.xlu1 %1103  ;;  %v3591_v3 = vpop.permute.xlu0 %1337 }
 0x468   : > { %v3558_v45 = vmul.f32 %v3555_v57, %v1084_v53  ;;  %1339 = vrot.lane.b32.xlu1 %v3523_v23, %s2684_s2  ;;  %1253 = vrot.lane.b32.xlu0 %v1117_v0, %s2697_s28  ;;  %v1106_v43 = vmul.f32 %v3555_v57, %v3517_v21 }
 0x46b   : > { %v3573_v59 = vpop.permute.xlu1 %1186  ;;  %v3595_v63 = vpop.permute.xlu0 %1311 }
 0x46c   : > { %1376 = vrot.lane.b32.xlu1 %v3523_v23, %s2699_s13  ;;  %1374 = vrot.lane.b32.xlu0 %v3517_v21, %s2699_s13 }
 0x46f   : > { %v3577_v26 = vpop.permute.xlu1 %1242 }
 0x470   : > { %1411 = vrot.lane.b32.xlu1 %v3517_v21, %s2700_s23  ;;  %1442 = vperm.xlu0 %2251, %v1439_v46   ;;  %v1472_v21 = vld [vmem:[#allocation12] sm:$0xff] }
 0x473   : > { %v3581_v60 = vpop.permute.xlu1 %1300 }
 0x474   : > { %1413 = vrot.lane.b32.xlu0 %v3523_v23, %s2700_s23 }
 0x477   : > { %v3585_v61 = vpop.permute.xlu1 %1356 }
 0x47b   : > { %v3589_v41 = vpop.permute.xlu1 %1309 }
 0x47f   : > { %v3593_v4 = vpop.permute.xlu1 %1430 }
 0x483   : > { %v3597_v9 = vpop.permute.xlu1 %1283 }
 0x4c6   : > { %v1132_v13 = vpop.permute.xlu1 %1131  ;;  %v1116_v14 = vpop.permute.xlu0 %1115 }
 0x4c7   : > { %v1118_v18 = vsel %vm3981_vm13, %v1116_v14, %v1114_v27  ;;  %v1615_v14 = vld [vmem:[#allocation12 + $0x38] sm:$0xff]  ;;  %vm3984_vm13 = vcmask 1006592  }
 0x4c8   : > { %1171 = vrot.lane.b32.xlu0 %v1118_v18, %s2696_s22  ;;  %1135 = vrot.lane.b32.xlu1 %v1118_v18, %s2694_s29  ;;  %s4036_s29 = sand.u32 1, %s2641_s14  }
 0x4ca   : > { %v1196_v19 = vpop.permute.xlu1 %1195  ;;  %v1168_v29 = vpop.permute.xlu0 %1167 }
 0x4cc   : > { %1227 = vrot.lane.b32.xlu0 %v1118_v18, %s2698_s30  ;;  %1199 = vrot.lane.b32.xlu1 %v1118_v18, %s2695_s11  ;;  %s1801_s11 = scalar_lea.sflag [#allocation5], %s4036_s29 }
 0x4ce   : > { %v1252_v24 = vpop.permute.xlu1 %1251  ;;  %v1224_v25 = vpop.permute.xlu0 %1223 }
 0x4d0   : > { %1285 = vrot.lane.b32.xlu0 %v3536_v55, %s2682_s10  ;;  %1255 = vrot.lane.b32.xlu1 %v1118_v18, %s2697_s28  ;;  %v1316_v18 = vsel %vm1315_vm11, %v3589_v41, %v3595_v63  ;;  %s2701_s10 = smov 64  }
 0x4d2   : > { %v3609_v44 = vpop.permute.xlu1 %1169  ;;  %v3611_v5 = vpop.permute.xlu0 %1133 }
 0x4d3   : > { %v1174_v31 = vsel %vm1173_vm0, %v1168_v29, %v3609_v44  ;;  %v1138_v32 = vsel %vm1137_vm4, %v1132_v13, %v3611_v5 }
 0x4d4   : > { %v1143_v37 = vsel %vm1119_vm9, %v1138_v32, 0.0  ;;  %1341 = vrot.lane.b32.xlu0 %v3536_v55, %s2684_s2  ;;  %1313 = vrot.lane.b32.xlu1 %v3536_v55, %s2683_s0  ;;  %v1179_v7 = vsel %vm1158_vm15, %v1174_v31, 0.0  ;;  %vm1257_vm9 = vcmask 793600   ;;  %vm4013_vm15 = vcmp.ge.s32.totalorder %v3094_v15, 1  ;;  %s4034_s0 = sld [smem:[#allocation37_spill]]  ;;  %s2005_s2 = sshll.u32 %s2653_s17, 1 }
 0x4d5   : > { %v1152_v20 = vmul.f32 %v3571_v58, %v1143_v37  ;;  %v1189_v49 = vmul.f32 %v3573_v59, %v1179_v7  ;;  %v1693_v7 = vld [vmem:[#allocation12 + $0x50] sm:$0xff] }
 0x4d6   : > { %v3624_v6 = vpop.permute.xlu0 %1197  ;;  %v3626_v22 = vpop.permute.xlu1 %1225 }
 0x4d7   : > { %v1155_v47 = vadd.f32 %v1152_v20, %v1106_v43  ;;  %v1202_v48 = vsel %vm1201_vm12, %v1196_v19, %v3624_v6  ;;  %v1230_v10 = vsel %vm1229_vm6, %v1224_v25, %v3626_v22 }
 0x4d8   : > { %v1207_v50 = vsel %vm504_vm1, %v1202_v48, 0.0  ;;  %1415 = vrot.lane.b32.xlu0 %v3536_v55, %s2700_s23  ;;  %1378 = vrot.lane.b32.xlu1 %v3536_v55, %s2699_s13  ;;  %v1235_v52 = vsel %vm535_vm3, %v1230_v10, 0.0  ;;  %vm1287_vm1 = vcmask 1039360   ;;  %vm1343_vm3 = vcmask 1022976   ;;  %s2002_s23 = sadd.s32 4294967291, %s1994_s20  ;;  %s1812_s20 = sadd.s32 %s2649_s16, %s2005_s2 }
 0x4d9   : > { %v1192_v2 = vadd.f32 %v1189_v49, %v1155_v47  ;;  %v1217_v28 = vmul.f32 %v3575_v40, %v1207_v50  ;;  %v1245_v53 = vmul.f32 %v3577_v26, %v1235_v52  ;;  %v1288_v55 = vsel %vm1287_vm1, %v1282_v62, %v3597_v9  ;;  %s2702_s16 = smov [#allocation18]  }
 0x4da   : > { %v3640_v30 = vpop.permute.xlu0 %1253  ;;  %v1293_v46 = vsel %vm597_vm14, %v1288_v55, 0.0  ;;  %v3654_v13 = vpop.permute.xlu1 %1339  ;;  %vm3983_vm14 = vcmask 1014784   ;;  %v3677_v48 = vstv %s2002_s23  ;;  %p4037_p3 = scmp.ne.s32.totalorder %s4034_s0, 0  ;;  %s2553_s22 = sshll.u32 %s2702_s16, 4  ;;  %s2554_s22 = int_to_ptr.vmem [resolvable:$false] %s2553_s22 }
 0x4db   : > { %v1258_v51 = vsel %vm1257_vm9, %v1252_v24, %v3640_v30  ;;  %v1220_v36 = vadd.f32 %v1217_v28, %v1192_v2  ;;  %v1303_v62 = vmul.f32 %v3581_v60, %v1293_v46  ;;  %v1641_v24 = vld [vmem:[#allocation12 + $0x40] sm:$0xff]  ;;  %v1344_v25 = vsel %vm1343_vm3, %v3591_v3, %v3654_v13  ;;  %s2555_s28 = scalar_lea.vmem %s2554_s22, 256 }
 0x4dc   : > { %1475 = vperm.xlu0 %2251, %v1472_v21   ;;  %v1263_v42 = vsel %vm4013_vm15, %v1258_v51, 0.0  ;;  %vm4014_vm15 = vcmp.lt.s32.totalorder %v3094_v15, 14  ;;  %v1349_v43 = vsel %vm659_vm10, %v1344_v25, 0.0  ;;  %v1550_v21 = vld [vmem:[#allocation12 + $0x18] sm:$0xff]  ;;  %v1087_v2 = vadd.s32 %v3677_v48, %v476_v34 }
 0x4dd   : > { %v1248_v27 = vadd.f32 %v1245_v53, %v1220_v36  ;;  %v1273_v0 = vmul.f32 %v3579_v33, %v1263_v42  ;;  %v1321_v29 = vsel %vm4014_vm15, %v1316_v18, 0.0  ;;  %vm1365_vm15 = vcmp.lt.s32.totalorder %v3094_v15, 12 }
 0x4de   : > { %v3665_v32 = vpop.permute.xlu1 %1376  ;;  %v1375_v37 = vpop.permute.xlu0 %1374  ;;  %v1331_v41 = vmul.f32 %v3583_v56, %v1321_v29  ;;  %v1359_v49 = vmul.f32 %v3585_v61, %v1349_v43  ;;  %vm1402_vm10 = vcmp.lt.s32.totalorder %v3094_v15, 11  ;;  %vm1093_vm2 = vcmp.lt.s32.totalorder %v1087_v2, 16 }
 0x4df   : > { %v1276_v19 = vadd.f32 %v1273_v0, %v1248_v27  ;;  %v1381_v3 = vsel %vm3983_vm14, %v1375_v37, %v3665_v32 }
 0x4e0   : > { %1527 = vperm.xlu0 %2251, %v1524_v35   ;;  %v1386_v50 = vsel %vm1365_vm15, %v1381_v3, 0.0  ;;  %vm1090_vm15 = vcmp.ge.s32.totalorder %v1087_v2, 0 }
 0x4e1   : > { %v1306_v31 = vadd.f32 %v1303_v62, %v1276_v19  ;;  %v1396_v52 = vmul.f32 %v3587_v39, %v1386_v50  ;;  %vm1096_vm14 = vmand %vm1090_vm15, %vm1093_vm2  ;;  %v1107_v62 = vmul.f32 %v3555_v57, %v3523_v23  ;;  %vm1160_vm2 = vcmp.ge.s32.totalorder %v3101_v17, 4 }
 0x4e2   : > { %v1412_v28 = vpop.permute.xlu1 %1411  ;;  %vm4024_vm15 = vcmp.lt.s32.totalorder %v3101_v17, 15 }
 0x4e3   : > { %v1334_v20 = vadd.f32 %v1331_v41, %v1306_v31 }
 0x4e4   : > { %1567 = vperm.xlu0 %2251, %v1564_v54   ;;  %v1498_v54 = vld [vmem:[#allocation12 + $0x8] sm:$0xff] }
 0x4e5   : > { %v1362_v10 = vadd.f32 %v1359_v49, %v1334_v20 }
 0x4e7   : > { %v1399_v42 = vadd.f32 %v1396_v52, %v1362_v10 }
 0x4e8   : > { %1618 = vperm.xlu0 %2251, %v1615_v14  }
 0x4ec   : > { %1644 = vperm.xlu0 %2251, %v1641_v24  }
 0x4ef   : > { %v3675_v47 = vpop.permute.xlu0 %1442 }
 0x4f0   : > { %1696 = vperm.xlu0 %2251, %v1693_v7  }
 0x4f3   : > { %v3684_v51 = vpop.permute.xlu0 %1413 }
 0x4f4   : > { %v1418_v35 = vsel %vm3984_vm13, %v1412_v28, %v3684_v51  ;;  %1553 = vperm.xlu0 %2251, %v1550_v21   ;;  %vm1121_vm13 = vcmp.ge.s32.totalorder %v3101_v17, 5 }
 0x4f5   : > { %v1423_v36 = vsel %vm1402_vm10, %v1418_v35, 0.0  ;;  %vm1120_vm10 = vcmp.ge.s32.totalorder %v3097_v16, 5 }
 0x4f6   : > { %v1433_v53 = vmul.f32 %v3593_v4, %v1423_v36 }
 0x4f8   : > { %v1436_v8 = vadd.f32 %v1433_v53, %v1399_v42 }
 0x4fa   : > { %v1445_v34 = vadd.f32 %v3675_v47, %v1436_v8 }
 0x4fc   : > { %v3691_v15 = vsel %vm1096_vm14, %v1445_v34, 0.0 }
 0x4fd   : > { %1466 = vrot.lane.b32.xlu1 %v3691_v15, %s2686_s15 }
 0x501   : > { %1501 = vperm.xlu1 %2252, %v1498_v54  }
 0x53a   : > { %v1136_v55 = vpop.permute.xlu1 %1135  ;;  %v1172_v27 = vpop.permute.xlu0 %1171 }
 0x53b   : > { %v1139_v0 = vsel %vm1137_vm4, %v3611_v5, %v1136_v55  ;;  %v1145_v46 = vsel %vm1121_vm13, %v1136_v55, 0.0  ;;  %v1175_v14 = vsel %vm1173_vm0, %v3609_v44, %v1172_v27  ;;  %vm1366_vm13 = vcmp.lt.s32.totalorder %v3097_v16, 12 }
 0x53c   : > { %v1144_v18 = vsel %vm1120_vm10, %v1139_v0, 0.0  ;;  %v1180_v19 = vsel %vm1159_vm5, %v1175_v14, 0.0  ;;  %v1154_v24 = vmul.f32 %v3571_v58, %v1145_v46  ;;  %vm4015_vm5 = vcmp.ge.s32.totalorder %v3097_v16, 3 }
 0x53d   : > { %v1153_v29 = vmul.f32 %v3571_v58, %v1144_v18  ;;  %v1190_v5 = vmul.f32 %v3573_v59, %v1180_v19  ;;  %v1181_v58 = vsel %vm1160_vm2, %v1172_v27, 0.0  ;;  %vm1403_vm0 = vcmp.lt.s32.totalorder %v3097_v16, 11 }
 0x53e   : > { %v1200_v25 = vpop.permute.xlu1 %1199  ;;  %v1228_v31 = vpop.permute.xlu0 %1227  ;;  %v1157_v20 = vadd.f32 %v1154_v24, %v3558_v45  ;;  %v1191_v2 = vmul.f32 %v3573_v59, %v1181_v58  ;;  %vm4020_vm4 = vcmp.ge.s32.totalorder %v3101_v17, 2  ;;  %vm4025_vm2 = vcmp.lt.s32.totalorder %v3101_v17, 14 }
 0x53f   : > { %v1156_v37 = vadd.f32 %v1153_v29, %v1107_v62  ;;  %v1203_v41 = vsel %vm1201_vm12, %v3624_v6, %v1200_v25  ;;  %v1231_v44 = vsel %vm1229_vm6, %v3626_v22, %v1228_v31  ;;  %v1209_v3 = vsel %vm506_vm7, %v1200_v25, 0.0 }
 0x540   : > { %v1208_v23 = vsel %vm4015_vm5, %v1203_v41, 0.0  ;;  %v1236_v57 = vsel %vm536_vm8, %v1231_v44, 0.0  ;;  %vm4016_vm8 = vcmp.ge.s32.totalorder %v3097_v16, 1  ;;  %vm4017_vm6 = vcmp.lt.s32.totalorder %v3097_v16, 15 }
 0x541   : > { %v1193_v43 = vadd.f32 %v1190_v5, %v1156_v37  ;;  %v1218_v7 = vmul.f32 %v3575_v40, %v1208_v23  ;;  %v1246_v22 = vmul.f32 %v3577_v26, %v1236_v57  ;;  %v1194_v36 = vadd.f32 %v1191_v2, %v1157_v20  ;;  %v1590_v20 = vld [vmem:[#allocation12 + $0x30] sm:$0xff] }
 0x542   : > { %v1256_v49 = vpop.permute.xlu1 %1255  ;;  %v1286_v6 = vpop.permute.xlu0 %1285  ;;  %v1219_v42 = vmul.f32 %v3575_v40, %v1209_v3  ;;  %vm4018_vm7 = vcmp.lt.s32.totalorder %v3097_v16, 14  ;;  %vm4019_vm12 = vcmp.lt.s32.totalorder %v3097_v16, 13  ;;  %vm1367_vm5 = vcmp.lt.s32.totalorder %v3101_v17, 12 }
 0x543   : > { %v1221_v50 = vadd.f32 %v1218_v7, %v1193_v43  ;;  %v1259_v21 = vsel %vm1257_vm9, %v3640_v30, %v1256_v49  ;;  %v1289_v10 = vsel %vm1287_vm1, %v3597_v9, %v1286_v6  ;;  %vm4022_vm9 = vcmask 1006592  }
 0x544   : > { %v1264_v28 = vsel %vm4016_vm8, %v1259_v21, 0.0  ;;  %v1294_v45 = vsel %vm4017_vm6, %v1289_v10, 0.0  ;;  %v1222_v0 = vadd.f32 %v1219_v42, %v1194_v36  ;;  %vm4023_vm1 = vcmp.ge.s32.totalorder %v3101_v17, 1 }
 0x545   : > { %v1249_v52 = vadd.f32 %v1246_v22, %v1221_v50  ;;  %v1274_v35 = vmul.f32 %v3579_v33, %v1264_v28  ;;  %v1304_v34 = vmul.f32 %v3581_v60, %v1294_v45  ;;  %v1265_v16 = vsel %vm4023_vm1, %v1256_v49, 0.0 }
 0x546   : > { %v1314_v53 = vpop.permute.xlu1 %1313  ;;  %v1342_v8 = vpop.permute.xlu0 %1341  ;;  %v1275_v5 = vmul.f32 %v3579_v33, %v1265_v16  ;;  %vm4026_vm8 = vcmp.lt.s32.totalorder %v3101_v17, 13  ;;  %vm1404_vm6 = vcmp.lt.s32.totalorder %v3101_v17, 11  ;;  %v1717_v17 = vld [vmem:[#allocation14] sm:$0xff]  ;;  %vm1516_vm1 = vcmask 261120  }
 0x547   : > { %v1277_v30 = vadd.f32 %v1274_v35, %v1249_v52  ;;  %v1317_v59 = vsel %vm1315_vm11, %v3595_v63, %v1314_v53  ;;  %v1345_v9 = vsel %vm1343_vm3, %v3654_v13, %v1342_v8  ;;  %v1237_v63 = vsel %vm4020_vm4, %v1228_v31, 0.0 }
 0x548   : > { %v1322_v54 = vsel %vm4018_vm7, %v1317_v59, 0.0  ;;  %v1350_v55 = vsel %vm4019_vm12, %v1345_v9, 0.0  ;;  %v1088_v13 = vadd.s32 %v3677_v48, %v477_v38  ;;  %vm4021_vm11 = vcmask 1014784  }
 0x549   : > { %v1307_v27 = vadd.f32 %v1304_v34, %v1277_v30  ;;  %v1332_v40 = vmul.f32 %v3583_v56, %v1322_v54  ;;  %v1360_v19 = vmul.f32 %v3585_v61, %v1350_v55  ;;  %v1247_v31 = vmul.f32 %v3577_v26, %v1237_v63 }
 0x54a   : > { %v1379_v46 = vpop.permute.xlu1 %1378  ;;  %v1416_v14 = vpop.permute.xlu0 %1415  ;;  %vm1091_vm3 = vcmp.ge.s32.totalorder %v1088_v13, 0  ;;  %vm1094_vm14 = vcmp.lt.s32.totalorder %v1088_v13, 16  ;;  %v1323_v26 = vsel %vm4025_vm2, %v1314_v53, 0.0  ;;  %v1351_v3 = vsel %vm4026_vm8, %v1342_v8, 0.0 }
 0x54b   : > { %v1335_v18 = vadd.f32 %v1332_v40, %v1307_v27  ;;  %v1382_v62 = vsel %vm4021_vm11, %v3665_v32, %v1379_v46  ;;  %v1419_v29 = vsel %vm4022_vm9, %v3684_v51, %v1416_v14  ;;  %v1250_v37 = vadd.f32 %v1247_v31, %v1222_v0  ;;  %vm1097_vm10 = vmand %vm1091_vm3, %vm1094_vm14 }
 0x54c   : > { %v1387_v24 = vsel %vm1366_vm13, %v1382_v62, 0.0  ;;  %v1424_v25 = vsel %vm1403_vm0, %v1419_v29, 0.0  ;;  %v1295_v51 = vsel %vm4024_vm15, %v1286_v6, 0.0  ;;  %v1333_v7 = vmul.f32 %v3583_v56, %v1323_v26 }
 0x54d   : > { %v1363_v11 = vadd.f32 %v1360_v19, %v1335_v18  ;;  %v1397_v38 = vmul.f32 %v3587_v39, %v1387_v24  ;;  %v1434_v32 = vmul.f32 %v3593_v4, %v1424_v25  ;;  %v1278_v23 = vadd.f32 %v1275_v5, %v1250_v37 }
 0x54e   : > { %v1305_v58 = vmul.f32 %v3581_v60, %v1295_v51  ;;  %v1388_v50 = vsel %vm1367_vm5, %v1379_v46, 0.0  ;;  %v1361_v60 = vmul.f32 %v3585_v61, %v1351_v3  ;;  %v1425_v56 = vsel %vm1404_vm6, %v1416_v14, 0.0 }
 0x54f   : > { %v1400_v41 = vadd.f32 %v1397_v38, %v1363_v11  ;;  %v1398_v21 = vmul.f32 %v3587_v39, %v1388_v50  ;;  %v1435_v45 = vmul.f32 %v3593_v4, %v1425_v56  ;;  %v1089_v52 = vadd.s32 %v3677_v48, %v478_v1  ;;  %v1458_v1 = vld [vmem:[#allocation12 + $0x28] sm:$0xff] }
 0x550   : > { %v1308_v33 = vadd.f32 %v1305_v58, %v1278_v23  ;;  %vm4027_vm0 = vcmask 1047808   ;;  %vm1490_vm9 = vcmask 392192   ;;  %vm1542_vm3 = vcmask 130048  }
 0x551   : > { %v1437_v44 = vadd.f32 %v1434_v32, %v1400_v41  ;;  %vm1092_vm7 = vcmp.ge.s32.totalorder %v1089_v52, 0  ;;  %vm1095_vm12 = vcmp.lt.s32.totalorder %v1089_v52, 16  ;;  %vm4028_vm4 = vmmov %vm4027_vm0  ;;  %vm1582_vm14 = vcmask 916480  }
 0x552   : > { %v1336_v49 = vadd.f32 %v1333_v7, %v1308_v33  ;;  %vm1098_vm13 = vmand %vm1092_vm7, %vm1095_vm12  ;;  %vm1633_vm15 = vcmask 785408   ;;  %vm1685_vm5 = vcmask 523264   ;;  %vm4032_vm8 = vcmask 1043456  }
 0x553   : > { %v1446_v57 = vadd.f32 %v3675_v47, %v1437_v44  ;;  %vm4029_vm11 = vmmov %vm4027_vm0  ;;  %vm4033_vm6 = vcmask 64512  }
 0x554   : > { %v1364_v22 = vadd.f32 %v1361_v60, %v1336_v49 }
 0x555   : > { %v3766_v43 = vsel %vm1097_vm10, %v1446_v57, 0.0  ;;  %vm4030_vm10 = vcmask 654336  }
 0x556   : > { %1468 = vrot.lane.b32.xlu1 %v3766_v43, %s2686_s15  ;;  %v1401_v2 = vadd.f32 %v1398_v21, %v1364_v22  ;;  %vm4031_vm2 = vmmov %vm4030_vm10 }
 0x558   : > { %v1438_v35 = vadd.f32 %v1435_v45, %v1401_v2 }
 0x55a   : > { %1593 = vperm.xlu1 %2252, %v1590_v20   ;;  %v1447_v39 = vadd.f32 %v3675_v47, %v1438_v35 }
 0x55b   : > { %v3774_v6 = vpop.permute.xlu0 %1475 }
 0x55c   : > { %v1456_v53 = vsel %vm1098_vm13, %v1447_v39, 0.0  ;;  %v1478_v27 = vmul.f32 %v3774_v6, %v3766_v43 }
 0x55f   : > { %v3779_v10 = vpop.permute.xlu0 %1527 }
 0x560   : > { %v1530_v0 = vmul.f32 %v3779_v10, %v3766_v43 }
 0x563   : > { %v3781_v28 = vpop.permute.xlu0 %1567 }
 0x567   : > { %v1619_v36 = vpop.permute.xlu0 %1618 }
 0x568   : > { %v1621_v61 = vmul.f32 %v1619_v36, %v3691_v15  ;;  %v1622_v46 = vmul.f32 %v1619_v36, %v3766_v43 }
 0x56a   : > { %1627 = vrot.lane.b32.xlu0 %v1621_v61, %s2689_s21 }
 0x56b   : > { %v1645_v9 = vpop.permute.xlu0 %1644 }
 0x56c   : > { %v1647_v54 = vmul.f32 %v1645_v9, %v3691_v15  ;;  %v1648_v55 = vmul.f32 %v1645_v9, %v3766_v43 }
 0x56e   : > { %1720 = vperm.xlu0 %2251, %v1717_v17  }
 0x56f   : > { %v1467_v42 = vpop.permute.xlu1 %1466  ;;  %v1697_v5 = vpop.permute.xlu0 %1696 }
 0x570   : > { %v3791_v4 = vsel %vm4027_vm0, %v1467_v42, %v1456_v53  ;;  %v1699_v41 = vmul.f32 %v1697_v5, %v3691_v15  ;;  %v1700_v26 = vmul.f32 %v1697_v5, %v3766_v43 }
 0x571   : > { %1560 = vrot.lane.b32.xlu1 %v3791_v4, %s2686_s15  ;;  %v1479_v40 = vmul.f32 %v3774_v6, %v3791_v4  ;;  %v1531_v63 = vmul.f32 %v3779_v10, %v3791_v4  ;;  %v1570_v13 = vmul.f32 %v3781_v28, %v3791_v4  ;;  %v1623_v18 = vmul.f32 %v1619_v36, %v3791_v4 }
 0x572   : > { %v1649_v31 = vmul.f32 %v1645_v9, %v3791_v4  ;;  %v1701_v44 = vmul.f32 %v1697_v5, %v3791_v4 }
 0x573   : > { %v1554_v58 = vpop.permute.xlu0 %1553 }
 0x575   : > { %1670 = vperm.xlu1 %2252, %v1667_v12  }
 0x579   : > { %1461 = vperm.xlu1 %2252, %v1458_v1  }
 0x580   : > { %v1502_v48 = vpop.permute.xlu1 %1501 }
 0x581   : > { %v1504_v8 = vmul.f32 %v1502_v48, %v3766_v43  ;;  %v1505_v14 = vmul.f32 %v1502_v48, %v3791_v4 }
 0x583   : > { %1510 = vrot.lane.b32.xlu0 %v1504_v8, %s2686_s15 }
 0x5c8   : > { %v1469_v47 = vpop.permute.xlu1 %1468 }
 0x5c9   : > { %v3825_v19 = vsel %vm4028_vm4, %v1469_v47, %v1467_v42 }
 0x5ca   : > { %v1506_v16 = vmul.f32 %v1502_v48, %v3825_v19  ;;  %v1480_v37 = vmul.f32 %v3774_v6, %v3825_v19  ;;  %v1532_v32 = vmul.f32 %v3779_v10, %v3825_v19  ;;  %v1571_v51 = vmul.f32 %v3781_v28, %v3825_v19 }
 0x5d9   : > { %v1594_v30 = vpop.permute.xlu1 %1593 }
 0x5da   : > { %v1596_v34 = vmul.f32 %v1594_v30, %v3691_v15  ;;  %v1597_v59 = vmul.f32 %v1594_v30, %v3766_v43  ;;  %v1598_v29 = vmul.f32 %v1594_v30, %v3791_v4 }
 0x5dc   : > { %1602 = vrot.lane.b32.xlu1 %v1596_v34, %s2688_s26  ;;  %1604 = vrot.lane.b32.xlu0 %v1597_v59, %s2688_s26  ;;  %v1628_v33 = vpop.permute.xlu0 %1627 }
 0x5e0   : > { %1655 = vrot.lane.b32.xlu0 %v1648_v55, %s2690_s19  ;;  %1653 = vrot.lane.b32.xlu1 %v1647_v54, %s2690_s19 }
 0x5e3   : > { %v1561_v62 = vpop.permute.xlu1 %1560 }
 0x5e4   : > { %1486 = vrot.lane.b32.xlu0 %v1479_v40, %s2685_s12  ;;  %1484 = vrot.lane.b32.xlu1 %v1478_v27, %s2685_s12  ;;  %v1562_v24 = vsel %vm4029_vm11, %v1561_v62, %v1469_v47 }
 0x5e5   : > { %v1572_v25 = vmul.f32 %v3781_v28, %v1562_v24 }
 0x5e8   : > { %1538 = vrot.lane.b32.xlu0 %v1531_v63, %s2687_s18  ;;  %1536 = vrot.lane.b32.xlu1 %v1530_v0, %s2687_s18  ;;  %v1557_v0 = vmul.f32 %v1554_v58, %v3825_v19 }
 0x5ec   : > { %1576 = vrot.lane.b32.xlu0 %v1570_v13, %s2688_s26  ;;  %1629 = vrot.lane.b32.xlu1 %v1622_v46, %s2689_s21 }
 0x5ed   : > { %v3856_v7 = vpop.permute.xlu0 %1720 }
 0x5f0   : > { %1631 = vrot.lane.b32.xlu0 %v1623_v18, %s2689_s21  ;;  %1512 = vrot.lane.b32.xlu1 %v1505_v14, %s2686_s15  ;;  %s4035_s21 = sld [smem:[#allocation43_spill]] }
 0x5f4   : > { %1514 = vrot.lane.b32.xlu0 %v1506_v16, %s2686_s15  ;;  %1606 = vrot.lane.b32.xlu1 %v1598_v29, %s2688_s26  ;;  %v1671_v11 = vpop.permute.xlu1 %1670  ;;  %s1816_s15 = sshll.u32 %s442_s24, 4  ;;  %s3884_s15 = int_to_ptr.vmem [resolvable:$true] %s1816_s15 }
 0x5f5   : > { %v1674_v38 = vmul.f32 %v1671_v11, %v3766_v43  ;;  %v1673_v23 = vmul.f32 %v1671_v11, %v3691_v15  ;;  %v1675_v57 = vmul.f32 %v1671_v11, %v3791_v4  ;;  %v1511_v20 = vpop.permute.xlu0 %1510  ;;  %s2549_s17 = scalar_lea.vmem %s3884_s15, 128  ;;  %p2556_p8 = scmp.lt.s32.totalorder %s3884_s15, %s2554_s22 }
 0x5f6   : > { %p2550_p1 = scmp.ne.s32.totalorder %s3884_s15, %s2549_s17  ;;  %p2557_p10 = scmp.lt.s32.totalorder %s2555_s28, %s2549_s17 }
 0x5f8   : > { %1580 = vrot.lane.b32.xlu0 %v1572_v25, %s2688_s26  ;;  %1657 = vrot.lane.b32.xlu1 %v1649_v31, %s2690_s19  ;;  %v1462_v3 = vpop.permute.xlu1 %1461  ;;  %p2551_p0 = pnand %p2550_p1, %p4037_p3  ;;  %p2558_p12 = por %p2557_p10, %p2556_p8 }
 0x5f9   : > { %v1464_v61 = vmul.f32 %v1462_v3, %v3691_v15  ;;  %v1465_v12 = vmul.f32 %v1462_v3, %v3766_v43  ;;  %v1556_v15 = vmul.f32 %v1554_v58, %v3791_v4 }
 0x5fa   : > { %p2552_p2 = pneg %p2551_p0 }
 0x5fc   : > { %1681 = vrot.lane.b32.xlu0 %v1674_v38, %s2701_s10  ;;  %1488 = vrot.lane.b32.xlu1 %v1480_v37, %s2685_s12  ;;  %p2559_p4 = pnand %p2558_p12, %p2552_p2 }
 0x600   : > { %1540 = vrot.lane.b32.xlu1 %v1532_v32, %s2687_s18  ;;  %1705 = vrot.lane.b32.xlu0 %v1699_v41, %s2685_s12 }
 0x604   : > { %1578 = vrot.lane.b32.xlu1 %v1571_v51, %s2688_s26  ;;  %1709 = vrot.lane.b32.xlu0 %v1701_v44, %s2685_s12 }
 0x608   : > { %1679 = vrot.lane.b32.xlu1 %v1673_v23, %s2701_s10 }
 0x60c   : > { %1683 = vrot.lane.b32.xlu1 %v1675_v57, %s2701_s10 }
 0x610   : > { %1707 = vrot.lane.b32.xlu1 %v1700_v26, %s2685_s12 }
 0x64e   : > { %v1603_v49 = vpop.permute.xlu1 %1602  ;;  %v1605_v6 = vpop.permute.xlu0 %1604 }
 0x64f   : > { %v1608_v16 = vsel %vm1582_vm14, %v1603_v49, %v1605_v6 }
 0x652   : > { %v1654_v50 = vpop.permute.xlu1 %1653  ;;  %v1656_v60 = vpop.permute.xlu0 %1655 }
 0x653   : > { %v1660_v41 = vsel %vm4030_vm10, %v1654_v50, %v1656_v60 }
 0x656   : > { %v1485_v22 = vpop.permute.xlu1 %1484  ;;  %v1487_v21 = vpop.permute.xlu0 %1486 }
 0x657   : > { %v1491_v36 = vsel %vm1490_vm9, %v1485_v22, %v1487_v21 }
 0x658   : > { %v1495_v53 = vadd.f32 %v1491_v36, %v1464_v61  ;;  %v1725_v36 = vld [vmem:[#allocation15] sm:$0xf] }
 0x65a   : > { %v1537_v10 = vpop.permute.xlu1 %1536  ;;  %v1539_v56 = vpop.permute.xlu0 %1538 }
 0x65b   : > { %v1543_v34 = vsel %vm1542_vm3, %v1537_v10, %v1539_v56 }
 0x65e   : > { %v1630_v2 = vpop.permute.xlu1 %1629  ;;  %v1577_v28 = vpop.permute.xlu0 %1576 }
 0x65f   : > { %v1634_v38 = vsel %vm1633_vm15, %v1628_v33, %v1630_v2 }
 0x662   : > { %v1513_v45 = vpop.permute.xlu1 %1512  ;;  %v1632_v52 = vpop.permute.xlu0 %1631 }
 0x663   : > { %v1517_v42 = vsel %vm1516_vm1, %v1511_v20, %v1513_v45  ;;  %v1635_v4 = vsel %vm1633_vm15, %v1630_v2, %v1632_v52  ;;  %v1728_v2 = vld [vmem:[#allocation17] sm:$0xff] }
 0x664   : > { %v1521_v1 = vadd.f32 %v1517_v42, %v1495_v53 }
 0x666   : > { %v1607_v35 = vpop.permute.xlu1 %1606  ;;  %v1515_v17 = vpop.permute.xlu0 %1514  ;;  %v1547_v9 = vadd.f32 %v1543_v34, %v1521_v1 }
 0x667   : > { %v1518_v59 = vsel %vm1516_vm1, %v1513_v45, %v1515_v17  ;;  %v1609_v24 = vsel %vm1582_vm14, %v1605_v6, %v1607_v35 }
 0x668   : > { %v1558_v46 = vadd.f32 %v1556_v15, %v1547_v9 }
 0x66a   : > { %v1658_v39 = vpop.permute.xlu1 %1657  ;;  %v1581_v47 = vpop.permute.xlu0 %1580 }
 0x66b   : > { %v1661_v32 = vsel %vm4031_vm2, %v1656_v60, %v1658_v39 }
 0x66e   : > { %v1489_v48 = vpop.permute.xlu1 %1488  ;;  %v1682_v43 = vpop.permute.xlu0 %1681 }
 0x66f   : > { %v1492_v8 = vsel %vm1490_vm9, %v1487_v21, %v1489_v48 }
 0x670   : > { %v1496_v30 = vadd.f32 %v1492_v8, %v1465_v12 }
 0x672   : > { %v1541_v54 = vpop.permute.xlu1 %1540  ;;  %v1522_v55 = vadd.f32 %v1518_v59, %v1496_v30  ;;  %v1706_v37 = vpop.permute.xlu0 %1705 }
 0x673   : > { %v1544_v27 = vsel %vm1542_vm3, %v1539_v56, %v1541_v54 }
 0x674   : > { %v1548_v40 = vadd.f32 %v1544_v27, %v1522_v55 }
 0x676   : > { %v1579_v63 = vpop.permute.xlu1 %1578  ;;  %v1559_v13 = vadd.f32 %v1557_v0, %v1548_v40  ;;  %v1710_v58 = vpop.permute.xlu0 %1709 }
 0x677   : > { %v1583_v14 = vsel %vm1582_vm14, %v1577_v28, %v1579_v63  ;;  %v1584_v18 = vsel %vm1582_vm14, %v1579_v63, %v1581_v47 }
 0x678   : > { %v1587_v62 = vadd.f32 %v1583_v14, %v1558_v46  ;;  %v1588_v29 = vadd.f32 %v1584_v18, %v1559_v13 }
 0x67a   : > { %v1612_v25 = vadd.f32 %v1608_v16, %v1587_v62  ;;  %v1613_v31 = vadd.f32 %v1609_v24, %v1588_v29  ;;  %v1680_v11 = vpop.permute.xlu1 %1679 }
 0x67b   : > { %v1686_v26 = vsel %vm1685_vm5, %v1680_v11, %v1682_v43 }
 0x67c   : > { %v1638_v5 = vadd.f32 %v1634_v38, %v1612_v25  ;;  %v1639_v19 = vadd.f32 %v1635_v4, %v1613_v31 }
 0x67e   : > { %v1664_v44 = vadd.f32 %v1660_v41, %v1638_v5  ;;  %v1684_v51 = vpop.permute.xlu1 %1683  ;;  %v1665_v23 = vadd.f32 %v1661_v32, %v1639_v19 }
 0x67f   : > { %v1687_v57 = vsel %vm1685_vm5, %v1682_v43, %v1684_v51 }
 0x680   : > { %v1690_v20 = vadd.f32 %v1686_v26, %v1664_v44  ;;  %v1691_v3 = vadd.f32 %v1687_v57, %v1665_v23 }
 0x682   : > { %v1708_v49 = vpop.permute.xlu1 %1707 }
 0x683   : > { %v1711_v33 = vsel %vm1490_vm9, %v1706_v37, %v1708_v49  ;;  %v1712_v6 = vsel %vm1490_vm9, %v1708_v49, %v1710_v58 }
 0x684   : > { %v1715_v22 = vadd.f32 %v1711_v33, %v1690_v20  ;;  %v1716_v21 = vadd.f32 %v1712_v6, %v1691_v3 }
 0x686   : > { %v1723_v50 = vadd.f32 %v3856_v7, %v1715_v22  ;;  %v1724_v60 = vadd.f32 %v3856_v7, %v1716_v21 }
 0x688   : > { %v1726_v10 = vpack.c.bf16 %v1723_v50, %v1723_v50  ;;  %v1727_v56 = vpack.c.bf16 %v1724_v60, %v1724_v60 }
 0x68a   : > { %1736 = vrot.lane.b32.xlu1 %v1726_v10, %s2685_s12  ;;  %1738 = vrot.lane.b32.xlu0 %v1727_v56, %s2685_s12  ;;  %s2006_s12 = sshll.u32 %s1812_s20, 7 }
 0x68b   : > { %s3882_s19 = scalar_lea.hbm %s4035_s21, %s2006_s12 }
 0x68e   : > { %1731 = vperm.xlu1 %2252, %v1728_v2  }
 0x6fc   : > { %v1737_v28 = vpop.permute.xlu1 %1736  ;;  %v1739_v45 = vpop.permute.xlu0 %1738 }
 0x6fd   : > { %v1741_v52 = vsel %vm1490_vm9, %v1737_v28, %v1739_v45 }
 0x6fe   : > { %v1746_v35 = vsel %vm4032_vm8, %v1741_v52, 0 }
 0x6ff   : > { %2028 = vmatpush3.bf16.msra.mxu0 %v1746_v35 }
 0x702   : > { %2030 = vmatmul.mubr.msk.bf16.vlgmr.msra.gmra.mrb[8].mxu0 %vm4033_vm6, %v1725_v36 }
 0x70d   : > { %v1732_v61 = vpop.permute.xlu1 %1731 }
 0x7d5   : > { %v1782_v7 = vpop.f32.mrb[8].mxu0 }
 0x7d6   : > { %v1783_v17 = vadd.f32 %v1782_v7, %v1732_v61  ;;  %v2031_v39 = vpop.f32.mrb[9].mxu0 }
 0x7d7   : > { %v1785_v42 = vpop.f32.mrb[10].mxu0 }
 0x7d8   : > { %v1788_v53 = vsub.f32 0.0, %v1783_v17  ;;  %v2032_v12 = vpop.f32.mrb[11].mxu0 }
 0x7da   : > { %v1789_v1 = vmul.f32 1.442695, %v1788_v53 }
 0x7dc   : > { %2265 = vpow2.f32 %v1789_v1 }
 0x7e6   : > { %v2266_v48 = vpop.eup %2265 }
 0x7e7   : > { %v1791_v8 = vadd.f32 1.0, %v2266_v48 }
 0x7e9   : > { %2267 = vrcp.f32 %v1791_v8 }
 0x7f3   : > { %v2268_v47 = vpop.eup %2267 }
 0x7f4   : > { %v1793_v30 = vmul.f32 %v2268_v47, %v1783_v17 }
 0x7f6   : > { %v1794_v34 = vsub.f32 0.0, %v1793_v30 }
 0x7f8   : > { %v1795_v59 = vmul.f32 1.442695, %v1794_v34 }
 0x7fa   : > { %2269 = vpow2.f32 %v1795_v59 }
 0x804   : > { %v2270_v9 = vpop.eup %2269 }
 0x805   : > { %v1797_v54 = vadd.f32 1.0, %v2270_v9 }
 0x807   : > { %2271 = vrcp.f32 %v1797_v54 }
 0x811   : > { %v2272_v55 = vpop.eup %2271 }
 0x812   : > { %1799 = vst [vmem:[%s442_s24] sm:$0xff] %v2272_v55 }
 0x813   : > { %2562 = shalt.err (!%p2559_p4)
}
 0x814   : > { %s2563_s25 = scalar_lea.hbm %s3882_s19, 128  ;;  %s2567_s13 = scalar_lea.hbm %s4035_s21, 512 }
 0x815   : > { %p2564_p5 = scmp.ne.s32.totalorder %s3882_s19, %s2563_s25  ;;  %p2568_p9 = scmp.lt.u32.totalorder %s3882_s19, %s4035_s21 }
 0x816   : > { %p2569_p11 = scmp.lt.u32.totalorder %s2567_s13, %s2563_s25  ;;  %p2571_p1 = scmp.lt.u32.totalorder %s2563_s25, %s3882_s19 }
 0x817   : > { %p2565_p6 = pnand %p2564_p5, %p4037_p3 }
 0x818   : > { %p2570_p13 = por %p2569_p11, %p2568_p9 }
 0x819   : > { %p2566_p7 = pneg %p2565_p6 }
 0x81a   : > { %p2572_p0 = por %p2571_p1, %p2570_p13 }
 0x81c   : > { %p2573_p2 = pnand %p2572_p0, %p2566_p7 }
 0x81e   : > { %2576 = shalt.err (!%p2573_p2)
}
 0x81f   : > { %2069 = dma.vmem_to_hbm [thread:$0]  (%p4037_p3), %s3884_s15, 128, %s3882_s19, %s1801_s11  }
 0x820 PF: > { %s4038_s2 = sld [smem:[#allocation35_spill]]  ;;  %s4039_s20 = sld [smem:[#allocation31_spill]] }
 0x821   : > { %s4040_s12 = sld [smem:[#allocation39_spill]] }
 0x826   : > { %p2121_p8 = scmp.ge.s32.totalorder %s4038_s2, 2  ;;  %s1828_s18 = sand.u32 1, %s4039_s20  }
 0x827   : > { %p4041_p10 = scmp.ne.s32.totalorder %s4040_s12, 0  ;;  %s1829_s26 = scalar_lea.sflag [#allocation5], %s1828_s18 }
 0x829   : > { %p2100_p12 = pnand %p2121_p8, %p4041_p10 }
 0x82b   : > { %2632 = dma.done.wait (!%p2100_p12), %s1829_s26, 128  }
 0x82c   : > { %2634 = vsyncadd (!%p2100_p12), %s1829_s26, 4294967168  ;;  %s28_s20 = sadd.s32 1, %s4038_s2   ;;  %s4042_s29 = sld [smem:[#allocation32_spill]] }
 0x82d   : > { %p25_p4 = scmp.ge.s32.totalorder %s28_s20, 6   ;;  %s4043_s15 = sld [smem:[#allocation40_spill]] }
 0x82e   : > { %s4044_s16 = sld [smem:[#allocation33_spill]]  ;;  %s4045_s17 = sld [smem:[#allocation34_spill]] }
 0x82f   : > { %s4046_s18 = sld [smem:[#allocation36_spill]]  ;;  %s4047_s19 = sld [smem:[#allocation38_spill]] }
 0x830   : > { %s4048_s13 = smov %s2641_s14  ;;  %27 = sbr.rel (!%p25_p4) target bundleno = 14 (0xe), region = 151 }
 0x832   : > { %s4049_s14 = smov %s4042_s29 }
 0x837   :  { %1834 = vsyncpa [#allocation4], 1 }
 0x838   :  { %1836 = vsyncpa [#allocation4 + $0x1], 1 }
 0x839   :  { %1837 = vsyncpa [#allocation7], 1 }
 0x83a   :  { %1838 = vsyncpa [#allocation10], 1 }
 0x83b   :  { %1839 = vsyncpa [#allocation13], 1 }
 0x83c   :  { %1840 = vsyncpa [#allocation16], 1 }
 0x83d   :  { %1841 = vsyncpa [#allocation5], 1 }
 0x83e   :  { %1843 = vsyncpa [#allocation5 + $0x1], 1 }

</bundles_post_ra>
